<compile_context>
chip_gen: v7x
topology: tpu7x:2x2x1
jax: 0.10.0
libtpu: 0.0.40
codegen_flags: <defaults>
</compile_context>

<pallas_src>
import functools
import math

import jax
import jax.numpy as jnp
from jax.experimental import pallas as pl
from jax.experimental.pallas import tpu as pltpu


# -----------------------------------------------------------------------------
# Generation-aware scoped-VMEM limit: ~3/4 of physical, capped at 100 MiB
# (v7x: 64 MiB physical -> 48 MiB; v5e/v6e: 128 MiB -> 96 MiB).
# -----------------------------------------------------------------------------
@functools.lru_cache(maxsize=None)
def _vmem_limit_bytes():
    try:
        cap = pltpu.get_tpu_info().vmem_capacity_bytes
        return min(int(cap * 3 // 4), 100 * 1024 * 1024)
    except Exception:
        return 48 * 1024 * 1024  # conservative fallback (safe on v7x)


def _fit(dim, preferred, align):
    """Largest multiple-of-`align` divisor of `dim` that is <= `preferred`.

    Falls back to the full dim (exempt from the (8,128) block constraint).
    """
    if dim <= preferred:
        return dim
    t = (preferred // align) * align
    while t >= align:
        if dim % t == 0:
            return t
        t -= align
    # TODO(synk): pad ragged dims (with masking on the KV axis) instead of
    # promoting to the full dimension; full-dim tiles can exceed v7x's 64 MiB VMEM.
    return dim


# -----------------------------------------------------------------------------
# Kernel 1: batched dense layer  y[g] = x[g] @ w[g] + b[g]
#   x: (G, M, K)   w: (G, K, N)  (already transposed to (in, out))   b: (G, 1, N)
# Full-K tile -> simple kernel (no accumulator); otherwise K-innermost
# accumulator kernel with f32 VMEM scratch.
# -----------------------------------------------------------------------------
def _linear_kernel_full_k(x_ref, w_ref, b_ref, o_ref):
    o_ref[0] = (jnp.dot(x_ref[0], w_ref[0], preferred_element_type=jnp.float32)
                + b_ref[0]).astype(o_ref.dtype)


def _linear_kernel_acc(x_ref, w_ref, b_ref, o_ref, acc_ref):
    k_idx = pl.program_id(3)

    @pl.when(k_idx == 0)
    def _init():
        acc_ref[...] = jnp.zeros_like(acc_ref)

    acc_ref[...] += jnp.dot(x_ref[0], w_ref[0],
                            preferred_element_type=jnp.float32)

    @pl.when(k_idx == pl.num_programs(3) - 1)
    def _store():
        o_ref[0] = (acc_ref[...] + b_ref[0]).astype(o_ref.dtype)


def batched_linear(x, w, b, *, out_dtype, tm=512, tn=2048, tk=2048):
    """x: (G, M, K), w: (G, K, N), b: (G, 1, N) -> (G, M, N)."""
    G, M, K = x.shape
    _, _, N = w.shape

    tk = _fit(K, tk, 128)   # prefer full-K (collapses the reduction axis)
    tn = _fit(N, tn, 128)   # prefer full-N (weights stay resident)

    # Ragged M: pad with zero rows to a tile multiple (never promote to full M).
    m_pad = 0
    if M > tm:
        tm = (tm // 8) * 8
        m_pad = (-M) % tm
        if m_pad:
            x = jnp.pad(x, ((0, 0), (0, m_pad), (0, 0)))
    else:
        tm = M
    Mp = M + m_pad
    vmem = _vmem_limit_bytes()

    if K // tk == 1:
        out = pl.pallas_call(
            _linear_kernel_full_k,
            out_shape=jax.ShapeDtypeStruct((G, Mp, N), out_dtype),
            grid_spec=pltpu.PrefetchScalarGridSpec(
                num_scalar_prefetch=0,
                grid=(G, Mp // tm, N // tn),
                in_specs=[
                    pl.BlockSpec((1, tm, K), lambda g, i, j: (g, i, 0)),
                    pl.BlockSpec((1, K, tn), lambda g, i, j: (g, 0, j)),
                    pl.BlockSpec((1, 1, tn), lambda g, i, j: (g, 0, j)),
                ],
                out_specs=pl.BlockSpec((1, tm, tn), lambda g, i, j: (g, i, j)),
            ),
            compiler_params=pltpu.CompilerParams(
                dimension_semantics=("parallel", "parallel", "parallel"),
                vmem_limit_bytes=vmem,
            ),
        )(x, w, b)
    else:
        out = pl.pallas_call(
            _linear_kernel_acc,
            out_shape=jax.ShapeDtypeStruct((G, Mp, N), out_dtype),
            grid_spec=pltpu.PrefetchScalarGridSpec(
                num_scalar_prefetch=0,
                grid=(G, Mp // tm, N // tn, K // tk),
                in_specs=[
                    pl.BlockSpec((1, tm, tk), lambda g, i, j, k: (g, i, k)),
                    pl.BlockSpec((1, tk, tn), lambda g, i, j, k: (g, k, j)),
                    pl.BlockSpec((1, 1, tn), lambda g, i, j, k: (g, 0, j)),
                ],
                out_specs=pl.BlockSpec((1, tm, tn), lambda g, i, j, k: (g, i, j)),
                scratch_shapes=[pltpu.VMEM((tm, tn), jnp.float32)],
            ),
            compiler_params=pltpu.CompilerParams(
                dimension_semantics=("parallel", "parallel", "parallel",
                                     "arbitrary"),
                vmem_limit_bytes=vmem,
            ),
        )(x, w, b)

    if m_pad:
        out = out[:, :M]
    return out


# -----------------------------------------------------------------------------
# Kernel 2: flash-style multi-head attention (online softmax over the KV axis).
# Q/K/V are read as d_model-wide column blocks of their input arrays, so the
# same kernel serves both the packed (B, S, 3*d_model) self-attention layout
# and three separate (B, S, d_model) arrays. The softmax scale is already
# folded into Wq/bq, so no per-score multiply happens here.
# -----------------------------------------------------------------------------
def _flash_mha_kernel(q_ref, k_ref, v_ref, o_ref, m_ref, l_ref, acc_ref,
                      *, num_heads, d_k):
    kv_idx = pl.program_id(2)

    @pl.when(kv_idx == 0)
    def _init():
        m_ref[...] = jnp.full_like(m_ref, -jnp.inf)
        l_ref[...] = jnp.zeros_like(l_ref)
        acc_ref[...] = jnp.zeros_like(acc_ref)

    q = q_ref[0]        # (tq,  d_model) bf16, 1/sqrt(d_k) already folded in
    k = k_ref[0]        # (tkv, d_model) bf16
    v = v_ref[0]        # (tkv, d_model) bf16

    # TODO(synk): for d_k < 128 the per-head column slices are not lane-aligned;
    # a head-major (h, tq, d_k) layout would keep this loop purely MXU/EUP-bound.
    for hd in range(num_heads):                      # static unroll over heads
        lo, hi = hd * d_k, (hd + 1) * d_k
        qh, kh, vh = q[:, lo:hi], k[:, lo:hi], v[:, lo:hi]

        # q . k^T contracting the last dims (no in-kernel transpose, no scaling).
        s = jax.lax.dot_general(qh, kh, (((1,), (1,)), ((), ())),
                                preferred_element_type=jnp.float32)   # (tq, tkv)

        m_prev = m_ref[hd]                                            # (tq, 1)
        m_new = jnp.maximum(m_prev, jnp.max(s, axis=-1, keepdims=True))
        alpha = jnp.exp(m_prev - m_new)
        p = jnp.exp(s - m_new)                                        # f32

        l_ref[hd] = alpha * l_ref[hd] + jnp.sum(p, axis=-1, keepdims=True)
        pv = jax.lax.dot_general(p.astype(vh.dtype), vh,
                                 (((1,), (0,)), ((), ())),
                                 preferred_element_type=jnp.float32)  # (tq, d_k)
        acc_ref[:, lo:hi] = alpha * acc_ref[:, lo:hi] + pv
        m_ref[hd] = m_new

    @pl.when(kv_idx == pl.num_programs(2) - 1)
    def _finalize():
        # Normalize the accumulator IN PLACE per head, then a single lane-dense
        # store of the whole (tq, d_model) slab (no concatenate / f32 temporary).
        for hd in range(num_heads):
            lo, hi = hd * d_k, (hd + 1) * d_k
            inv_l = pl.reciprocal(l_ref[hd], approx=True)   # EUP, ~free
            acc_ref[:, lo:hi] = acc_ref[:, lo:hi] * inv_l
        o_ref[0] = acc_ref[...].astype(o_ref.dtype)


def flash_mha(q_arr, k_arr, v_arr, *, d_model, num_heads,
              q_col=0, k_col=0, v_col=0, out_dtype=jnp.bfloat16,
              tq=256, tkv=256):
    """q/k/v arrays are (B, S, C); *_col selects the d_model-wide column block
    inside C (C == 3*d_model for the packed self-attention layout)."""
    B, S, _ = q_arr.shape
    assert d_model % num_heads == 0
    d_k = d_model // num_heads
    tq = _fit(S, tq, 8)
    tkv = _fit(S, tkv, 8)

    kernel = functools.partial(_flash_mha_kernel, num_heads=num_heads, d_k=d_k)
    return pl.pallas_call(
        kernel,
        out_shape=jax.ShapeDtypeStruct((B, S, d_model), out_dtype),
        grid_spec=pltpu.PrefetchScalarGridSpec(
            num_scalar_prefetch=0,
            grid=(B, S // tq, S // tkv),
            in_specs=[
                pl.BlockSpec((1, tq, d_model), lambda b, qi, ki: (b, qi, q_col)),
                pl.BlockSpec((1, tkv, d_model), lambda b, qi, ki: (b, ki, k_col)),
                pl.BlockSpec((1, tkv, d_model), lambda b, qi, ki: (b, ki, v_col)),
            ],
            out_specs=pl.BlockSpec((1, tq, d_model), lambda b, qi, ki: (b, qi, 0)),
            scratch_shapes=[
                pltpu.VMEM((num_heads, tq, 1), jnp.float32),   # running max m
                pltpu.VMEM((num_heads, tq, 1), jnp.float32),   # running sum l
                pltpu.VMEM((tq, d_model), jnp.float32),        # output accumulator
            ],
        ),
        compiler_params=pltpu.CompilerParams(
            dimension_semantics=("parallel", "parallel", "arbitrary"),
            vmem_limit_bytes=_vmem_limit_bytes(),
        ),
    )(q_arr, k_arr, v_arr)


# -----------------------------------------------------------------------------
# One-time weight packing (done OUTSIDE the per-forward wrapper / jit).
# -----------------------------------------------------------------------------
def pack_mha_params(params, h, compute_dtype=jnp.bfloat16):
    """PyTorch (out,in) -> (in,out), bf16 cast, QKV fused along N, and the
    1/sqrt(d_k) softmax scale folded into Wq / bq."""
    d_model = params["Wq"].shape[0]
    scale = 1.0 / math.sqrt(d_model // h)

    wq = (params["Wq"] * scale).T
    wk = params["Wk"].T
    wv = params["Wv"].T
    bq = params["bq"] * scale

    f32 = jnp.float32
    return {
        # fused QKV projection (self-attention fast path)
        "w_qkv": jnp.concatenate([wq, wk, wv], axis=1).astype(compute_dtype)[None],
        "b_qkv": jnp.concatenate([bq, params["bk"], params["bv"]])
                    .astype(f32)[None, None, :],
        # separate projections (general / cross-attention path)
        "w_q": wq.astype(compute_dtype)[None],
        "w_k": wk.astype(compute_dtype)[None],
        "w_v": wv.astype(compute_dtype)[None],
        "b_q": bq.astype(f32)[None, None, :],
        "b_k": params["bk"].astype(f32)[None, None, :],
        "b_v": params["bv"].astype(f32)[None, None, :],
        # output projection
        "w_o": params["Wo"].T.astype(compute_dtype)[None],
        "b_o": params["bo"].astype(f32)[None, None, :],
    }


# -----------------------------------------------------------------------------
# Module forward (eval-mode dropout, mask=None).
# -----------------------------------------------------------------------------
def mha_forward(query, key, value, packed, h, compute_dtype=jnp.bfloat16):
    """General path: query / key / value may differ (cross-attention)."""
    B, S, d_model = query.shape

    def proj(x, w, b):
        y = batched_linear(x.reshape(1, B * S, d_model).astype(compute_dtype),
                           w, b, out_dtype=compute_dtype)
        return y.reshape(B, S, d_model)

    q = proj(query, packed["w_q"], packed["b_q"])
    k = proj(key, packed["w_k"], packed["b_k"])
    v = proj(value, packed["w_v"], packed["b_v"])

    attn = flash_mha(q, k, v, d_model=d_model, num_heads=h,
                     out_dtype=compute_dtype)

    out = batched_linear(attn.reshape(1, B * S, d_model),
                         packed["w_o"], packed["b_o"], out_dtype=jnp.float32)
    return out.reshape(B, S, d_model)


def mha_self_attention(x, packed, h, compute_dtype=jnp.bfloat16):
    """Self-attention fast path: ONE fused QKV projection (weights concatenated
    along N); flash attention reads Q/K/V as column blocks of the packed output
    (no 3x activation stack, no extra HBM copies)."""
    B, S, d_model = x.shape
    if d_model % 128 != 0:
        # Column-block addressing of the packed array needs lane-aligned
        # d_model; otherwise fall back to the general path.
        return mha_forward(x, x, x, packed, h, compute_dtype)

    qkv = batched_linear(x.reshape(1, B * S, d_model).astype(compute_dtype),
                         packed["w_qkv"], packed["b_qkv"],
                         out_dtype=compute_dtype)
    qkv = qkv.reshape(B, S, 3 * d_model)        # free row-major reshape

    attn = flash_mha(qkv, qkv, qkv, d_model=d_model, num_heads=h,
                     q_col=0, k_col=1, v_col=2, out_dtype=compute_dtype)

    out = batched_linear(attn.reshape(1, B * S, d_model),
                         packed["w_o"], packed["b_o"], out_dtype=jnp.float32)
    return out.reshape(B, S, d_model)


# -----------------------------------------------------------------------------
# Demo / smoke test.
# -----------------------------------------------------------------------------
if __name__ == "__main__":
    B, S, h, d_model = 2, 8, 4, 128

    key0 = jax.random.PRNGKey(0)
    keys = jax.random.split(key0, 11)

    def init_linear(kw, kb, fan_in, fan_out):
        bound = 1.0 / math.sqrt(fan_in)
        w = jax.random.uniform(kw, (fan_out, fan_in), jnp.float32, -bound, bound)
        b = jax.random.uniform(kb, (fan_out,), jnp.float32, -bound, bound)
        return w, b

    Wq, bq = init_linear(keys[0], keys[1], d_model, d_model)
    Wk, bk = init_linear(keys[2], keys[3], d_model, d_model)
    Wv, bv = init_linear(keys[4], keys[5], d_model, d_model)
    Wo, bo = init_linear(keys[6], keys[7], d_model, d_model)
    params = dict(Wq=Wq, bq=bq, Wk=Wk, bk=bk, Wv=Wv, bv=bv, Wo=Wo, bo=bo)

    # One-time packing (NOT per forward call).
    packed = pack_mha_params(params, h)

    query = jax.random.normal(keys[8], (B, S, d_model), jnp.float32)
    key_in = jax.random.normal(keys[9], (B, S, d_model), jnp.float32)
    value = jax.random.normal(keys[10], (B, S, d_model), jnp.float32)

    self_fn = jax.jit(functools.partial(mha_self_attention, h=h))
    cross_fn = jax.jit(functools.partial(mha_forward, h=h))

    out_self = jax.block_until_ready(self_fn(query, packed))
    out_cross = jax.block_until_ready(cross_fn(query, key_in, value, packed))

    # Pure-JAX reference (same math as the PyTorch module, eval-mode dropout),
    # quantized to bf16 at the same points as the kernel path.
    def ref_forward(q_in, k_in, v_in):
        d_k = d_model // h
        scale = 1.0 / math.sqrt(d_k)
        bf = lambda a: a.astype(jnp.bfloat16).astype(jnp.float32)

        q = bf(q_in) @ bf(Wq.T * scale) + bq * scale   # scale folded like kernel
        k = bf(k_in) @ bf(Wk.T) + bk
        v = bf(v_in) @ bf(Wv.T) + bv

        def split(t):
            return bf(t).reshape(B, S, h, d_k).transpose(0, 2, 1, 3)

        qh, kh, vh = split(q), split(k), split(v)
        s = jnp.einsum("bhqd,bhkd->bhqk", qh, kh)
        p = jax.nn.softmax(s, axis=-1)
        xh = jnp.einsum("bhqk,bhkd->bhqd", bf(p), vh)
        xh = xh.transpose(0, 2, 1, 3).reshape(B, S, d_model)
        return bf(xh) @ bf(Wo.T) + bo

    for name, out, ref in [
        ("self", out_self, ref_forward(query, query, query)),
        ("cross", out_cross, ref_forward(query, key_in, value)),
    ]:
        max_err = float(jnp.max(jnp.abs(out - ref)))
        assert jnp.allclose(out, ref, atol=3e-2, rtol=3e-2), (
            f"{name}-attention mismatch vs reference, max abs err {max_err}")

    print("KERNEL_OK")
</pallas_src>

<mosaic_0001>
module attributes {stable_mosaic.version = 11 : i64} {
  func.func @_linear_kernel_full_k(%arg0: i32, %arg1: i32, %arg2: i32, %arg3: memref<1x16x128xbf16, #tpu.memory_space<vmem>>, %arg4: memref<1x128x128xbf16, #tpu.memory_space<vmem>>, %arg5: memref<1x1x128xf32, #tpu.memory_space<vmem>>, %arg6: memref<1x16x128xf32, #tpu.memory_space<vmem>>) attributes {dimension_semantics = [#tpu.dimension_semantics<parallel>, #tpu.dimension_semantics<parallel>, #tpu.dimension_semantics<parallel>], iteration_bounds = array<i64: 1, 1, 1>, scalar_prefetch = 0 : i64, scratch_operands = 0 : i64, tpu.core_type = #tpu.core_type<tc>, window_params = [{transform_indices = @transform_0, window_bounds = array<i64: 1, 16, 128>}, {transform_indices = @transform_1, window_bounds = array<i64: 1, 128, 128>}, {transform_indices = @transform_2, window_bounds = array<i64: 1, 1, 128>}, {transform_indices = @transform_3, window_bounds = array<i64: 1, 16, 128>}]} {
    %c0 = arith.constant 0 : index
    %c0_0 = arith.constant 0 : index
    %c0_1 = arith.constant 0 : index
    %0 = vector.load %arg3[%c0, %c0_0, %c0_1] : memref<1x16x128xbf16, #tpu.memory_space<vmem>>, vector<1x16x128xbf16>
    %1 = vector.shape_cast %0 : vector<1x16x128xbf16> to vector<16x128xbf16>
    %c0_2 = arith.constant 0 : index
    %c0_3 = arith.constant 0 : index
    %c0_4 = arith.constant 0 : index
    %2 = vector.load %arg4[%c0_2, %c0_3, %c0_4] : memref<1x128x128xbf16, #tpu.memory_space<vmem>>, vector<1x128x128xbf16>
    %3 = vector.shape_cast %2 : vector<1x128x128xbf16> to vector<128x128xbf16>
    %cst = arith.constant dense<0.000000e+00> : vector<16x128xf32>
    %4 = tpu.matmul %1, %3, %cst {dimension_numbers = #tpu.dot_dimension_numbers<[1], [0], [0], [1], [0, 0, 1, 1], [], []>} : vector<16x128xbf16>, vector<128x128xbf16>, vector<16x128xf32> -> vector<16x128xf32>
    %c0_5 = arith.constant 0 : index
    %c0_6 = arith.constant 0 : index
    %c0_7 = arith.constant 0 : index
    %5 = vector.load %arg5[%c0_5, %c0_6, %c0_7] : memref<1x1x128xf32, #tpu.memory_space<vmem>>, vector<1x1x128xf32>
    %6 = vector.shape_cast %5 : vector<1x1x128xf32> to vector<1x128xf32>
    %7 = vector.broadcast %6 : vector<1x128xf32> to vector<16x128xf32>
    %8 = arith.addf %4, %7 : vector<16x128xf32>
    %c0_8 = arith.constant 0 : index
    %c0_9 = arith.constant 0 : index
    %c0_10 = arith.constant 0 : index
    %9 = vector.load %arg6[%c0_8, %c0_9, %c0_10] : memref<1x16x128xf32, #tpu.memory_space<vmem>>, vector<1x16x128xf32>
    %10 = vector.shape_cast %9 : vector<1x16x128xf32> to vector<16x128xf32>
    %11 = vector.shape_cast %8 : vector<16x128xf32> to vector<1x16x128xf32>
    tpu.vector_store %arg6[%c0_8, %c0_9, %c0_10], %11 {strides = array<i32>} : memref<1x16x128xf32, #tpu.memory_space<vmem>>, vector<1x16x128xf32>,
    return
  }
  func.func @transform_0(%arg0: i32, %arg1: i32, %arg2: i32) -> (i32, i32, i32) {
    %c0_i32 = arith.constant 0 : i32
    %c0_i32_0 = arith.constant 0 : i32
    return %arg0, %arg1, %c0_i32 : i32, i32, i32
  }
  func.func @transform_1(%arg0: i32, %arg1: i32, %arg2: i32) -> (i32, i32, i32) {
    %c0_i32 = arith.constant 0 : i32
    %c0_i32_0 = arith.constant 0 : i32
    return %arg0, %c0_i32, %arg2 : i32, i32, i32
  }
  func.func @transform_2(%arg0: i32, %arg1: i32, %arg2: i32) -> (i32, i32, i32) {
    %c0_i32 = arith.constant 0 : i32
    %c0_i32_0 = arith.constant 0 : i32
    return %arg0, %c0_i32, %arg2 : i32, i32, i32
  }
  func.func @transform_3(%arg0: i32, %arg1: i32, %arg2: i32) -> (i32, i32, i32) {
    %c0_i32 = arith.constant 0 : i32
    return %arg0, %arg1, %arg2 : i32, i32, i32
  }
}

module attributes {stable_mosaic.version = 11 : i64} {
  func.func @_flash_mha_kernel(%arg0: i32, %arg1: i32, %arg2: i32, %arg3: memref<1x8x128xbf16, #tpu.memory_space<vmem>>, %arg4: memref<1x8x128xbf16, #tpu.memory_space<vmem>>, %arg5: memref<1x8x128xbf16, #tpu.memory_space<vmem>>, %arg6: memref<1x8x128xbf16, #tpu.memory_space<vmem>>, %arg7: memref<4x8x1xf32, #tpu.memory_space<vmem>>, %arg8: memref<4x8x1xf32, #tpu.memory_space<vmem>>, %arg9: memref<8x128xf32, #tpu.memory_space<vmem>>) attributes {dimension_semantics = [#tpu.dimension_semantics<parallel>, #tpu.dimension_semantics<parallel>, #tpu.dimension_semantics<arbitrary>], iteration_bounds = array<i64: 2, 1, 1>, scalar_prefetch = 0 : i64, scratch_operands = 3 : i64, tpu.core_type = #tpu.core_type<tc>, window_params = [{transform_indices = @transform_0, window_bounds = array<i64: 1, 8, 128>}, {transform_indices = @transform_1, window_bounds = array<i64: 1, 8, 128>}, {transform_indices = @transform_2, window_bounds = array<i64: 1, 8, 128>}, {transform_indices = @transform_3, window_bounds = array<i64: 1, 8, 128>}]} {
    %c0_i32 = arith.constant 0 : i32
    %0 = arith.cmpi eq, %arg2, %c0_i32 : i32
    %1 = arith.extui %0 : i1 to i32
    %c0_i32_0 = arith.constant 0 : i32
    %2 = arith.cmpi ne, %1, %c0_i32_0 : i32
    scf.if %2 {
      %cst_84 = arith.constant 0xFF800000 : f32
      %144 = vector.broadcast %cst_84 : f32 to vector<4x8x1xf32>
      %c0_85 = arith.constant 0 : index
      %c0_86 = arith.constant 0 : index
      %c0_87 = arith.constant 0 : index
      %145 = vector.load %arg7[%c0_85, %c0_86, %c0_87] : memref<4x8x1xf32, #tpu.memory_space<vmem>>, vector<4x8x1xf32>
      tpu.vector_store %arg7[%c0_85, %c0_86, %c0_87], %144 {strides = array<i32>} : memref<4x8x1xf32, #tpu.memory_space<vmem>>, vector<4x8x1xf32>,
      %cst_88 = arith.constant 0.000000e+00 : f32
      %146 = vector.broadcast %cst_88 : f32 to vector<4x8x1xf32>
      %c0_89 = arith.constant 0 : index
      %c0_90 = arith.constant 0 : index
      %c0_91 = arith.constant 0 : index
      %147 = vector.load %arg8[%c0_89, %c0_90, %c0_91] : memref<4x8x1xf32, #tpu.memory_space<vmem>>, vector<4x8x1xf32>
      tpu.vector_store %arg8[%c0_89, %c0_90, %c0_91], %146 {strides = array<i32>} : memref<4x8x1xf32, #tpu.memory_space<vmem>>, vector<4x8x1xf32>,
      %cst_92 = arith.constant 0.000000e+00 : f32
      %148 = vector.broadcast %cst_92 : f32 to vector<8x128xf32>
      %c0_93 = arith.constant 0 : index
      %c0_94 = arith.constant 0 : index
      %149 = vector.load %arg9[%c0_93, %c0_94] : memref<8x128xf32, #tpu.memory_space<vmem>>, vector<8x128xf32>
      tpu.vector_store %arg9[%c0_93, %c0_94], %148 {strides = array<i32>} : memref<8x128xf32, #tpu.memory_space<vmem>>, vector<8x128xf32>,
    } else {
    }
    %c0 = arith.constant 0 : index
    %c0_1 = arith.constant 0 : index
    %c0_2 = arith.constant 0 : index
    %3 = vector.load %arg3[%c0, %c0_1, %c0_2] : memref<1x8x128xbf16, #tpu.memory_space<vmem>>, vector<1x8x128xbf16>
    %4 = vector.shape_cast %3 : vector<1x8x128xbf16> to vector<8x128xbf16>
    %c0_3 = arith.constant 0 : index
    %c0_4 = arith.constant 0 : index
    %c0_5 = arith.constant 0 : index
    %5 = vector.load %arg4[%c0_3, %c0_4, %c0_5] : memref<1x8x128xbf16, #tpu.memory_space<vmem>>, vector<1x8x128xbf16>
    %6 = vector.shape_cast %5 : vector<1x8x128xbf16> to vector<8x128xbf16>
    %c0_6 = arith.constant 0 : index
    %c0_7 = arith.constant 0 : index
    %c0_8 = arith.constant 0 : index
    %7 = vector.load %arg5[%c0_6, %c0_7, %c0_8] : memref<1x8x128xbf16, #tpu.memory_space<vmem>>, vector<1x8x128xbf16>
    %8 = vector.shape_cast %7 : vector<1x8x128xbf16> to vector<8x128xbf16>
    %9 = vector.extract_strided_slice %4 {offsets = [0, 0], sizes = [8, 32], strides = [1, 1]} : vector<8x128xbf16> to vector<8x32xbf16>
    %10 = vector.extract_strided_slice %6 {offsets = [0, 0], sizes = [8, 32], strides = [1, 1]} : vector<8x128xbf16> to vector<8x32xbf16>
    %11 = vector.extract_strided_slice %8 {offsets = [0, 0], sizes = [8, 32], strides = [1, 1]} : vector<8x128xbf16> to vector<8x32xbf16>
    %cst = arith.constant dense<0.000000e+00> : vector<8x8xf32>
    %12 = tpu.matmul %9, %10, %cst {dimension_numbers = #tpu.dot_dimension_numbers<[1], [1], [0], [0], [0, 0, 1, 0], [], []>} : vector<8x32xbf16>, vector<8x32xbf16>, vector<8x8xf32> -> vector<8x8xf32>
    %c0_9 = arith.constant 0 : index
    %c0_10 = arith.constant 0 : index
    %c0_11 = arith.constant 0 : index
    %13 = vector.load %arg7[%c0_9, %c0_10, %c0_11] : memref<4x8x1xf32, #tpu.memory_space<vmem>>, vector<1x8x1xf32>
    %14 = vector.shape_cast %13 : vector<1x8x1xf32> to vector<8x1xf32>
    %cst_12 = arith.constant dense<0xFF800000> : vector<8xf32>
    %15 = vector.multi_reduction <maximumf>, %12, %cst_12 [1] : vector<8x8xf32> to vector<8xf32>
    %16 = vector.shape_cast %15 : vector<8xf32> to vector<8x1xf32>
    %17 = arith.maximumf %14, %16 : vector<8x1xf32>
    %18 = arith.subf %14, %17 : vector<8x1xf32>
    %19 = math.exp %18 : vector<8x1xf32>
    %20 = vector.broadcast %17 : vector<8x1xf32> to vector<8x8xf32>
    %21 = arith.subf %12, %20 : vector<8x8xf32>
    %22 = math.exp %21 : vector<8x8xf32>
    %c0_13 = arith.constant 0 : index
    %c0_14 = arith.constant 0 : index
    %c0_15 = arith.constant 0 : index
    %23 = vector.load %arg8[%c0_13, %c0_14, %c0_15] : memref<4x8x1xf32, #tpu.memory_space<vmem>>, vector<1x8x1xf32>
    %24 = vector.shape_cast %23 : vector<1x8x1xf32> to vector<8x1xf32>
    %25 = arith.mulf %19, %24 : vector<8x1xf32>
    %cst_16 = arith.constant dense<0.000000e+00> : vector<8xf32>
    %26 = vector.multi_reduction <add>, %22, %cst_16 [1] : vector<8x8xf32> to vector<8xf32>
    %27 = vector.shape_cast %26 : vector<8xf32> to vector<8x1xf32>
    %28 = arith.addf %25, %27 : vector<8x1xf32>
    %c0_17 = arith.constant 0 : index
    %c0_18 = arith.constant 0 : index
    %c0_19 = arith.constant 0 : index
    %29 = vector.load %arg8[%c0_17, %c0_18, %c0_19] : memref<4x8x1xf32, #tpu.memory_space<vmem>>, vector<1x8x1xf32>
    %30 = vector.shape_cast %29 : vector<1x8x1xf32> to vector<8x1xf32>
    %31 = vector.shape_cast %28 : vector<8x1xf32> to vector<1x8x1xf32>
    tpu.vector_store %arg8[%c0_17, %c0_18, %c0_19], %31 {strides = array<i32>} : memref<4x8x1xf32, #tpu.memory_space<vmem>>, vector<1x8x1xf32>,
    %32 = arith.truncf %22 : vector<8x8xf32> to vector<8x8xbf16>
    %cst_20 = arith.constant dense<0.000000e+00> : vector<8x32xf32>
    %33 = tpu.matmul %32, %11, %cst_20 {dimension_numbers = #tpu.dot_dimension_numbers<[1], [0], [0], [1], [0, 0, 1, 1], [], []>} : vector<8x8xbf16>, vector<8x32xbf16>, vector<8x32xf32> -> vector<8x32xf32>
    %c0_21 = arith.constant 0 : index
    %c0_22 = arith.constant 0 : index
    %34 = vector.load %arg9[%c0_21, %c0_22] : memref<8x128xf32, #tpu.memory_space<vmem>>, vector<8x32xf32>
    %35 = vector.broadcast %19 : vector<8x1xf32> to vector<8x32xf32>
    %36 = arith.mulf %35, %34 : vector<8x32xf32>
    %37 = arith.addf %36, %33 : vector<8x32xf32>
    %c0_23 = arith.constant 0 : index
    %c0_24 = arith.constant 0 : index
    %38 = vector.load %arg9[%c0_23, %c0_24] : memref<8x128xf32, #tpu.memory_space<vmem>>, vector<8x32xf32>
    tpu.vector_store %arg9[%c0_23, %c0_24], %37 {strides = array<i32>} : memref<8x128xf32, #tpu.memory_space<vmem>>, vector<8x32xf32>,
    %c0_25 = arith.constant 0 : index
    %c0_26 = arith.constant 0 : index
    %c0_27 = arith.constant 0 : index
    %39 = vector.load %arg7[%c0_25, %c0_26, %c0_27] : memref<4x8x1xf32, #tpu.memory_space<vmem>>, vector<1x8x1xf32>
    %40 = vector.shape_cast %39 : vector<1x8x1xf32> to vector<8x1xf32>
    %41 = vector.shape_cast %17 : vector<8x1xf32> to vector<1x8x1xf32>
    tpu.vector_store %arg7[%c0_25, %c0_26, %c0_27], %41 {strides = array<i32>} : memref<4x8x1xf32, #tpu.memory_space<vmem>>, vector<1x8x1xf32>,
    %42 = vector.extract_strided_slice %4 {offsets = [0, 32], sizes = [8, 32], strides = [1, 1]} : vector<8x128xbf16> to vector<8x32xbf16>
    %43 = vector.extract_strided_slice %6 {offsets = [0, 32], sizes = [8, 32], strides = [1, 1]} : vector<8x128xbf16> to vector<8x32xbf16>
    %44 = vector.extract_strided_slice %8 {offsets = [0, 32], sizes = [8, 32], strides = [1, 1]} : vector<8x128xbf16> to vector<8x32xbf16>
    %cst_28 = arith.constant dense<0.000000e+00> : vector<8x8xf32>
    %45 = tpu.matmul %42, %43, %cst_28 {dimension_numbers = #tpu.dot_dimension_numbers<[1], [1], [0], [0], [0, 0, 1, 0], [], []>} : vector<8x32xbf16>, vector<8x32xbf16>, vector<8x8xf32> -> vector<8x8xf32>
    %c1 = arith.constant 1 : index
    %c0_29 = arith.constant 0 : index
    %c0_30 = arith.constant 0 : index
    %46 = vector.load %arg7[%c1, %c0_29, %c0_30] : memref<4x8x1xf32, #tpu.memory_space<vmem>>, vector<1x8x1xf32>
    %47 = vector.shape_cast %46 : vector<1x8x1xf32> to vector<8x1xf32>
    %cst_31 = arith.constant dense<0xFF800000> : vector<8xf32>
    %48 = vector.multi_reduction <maximumf>, %45, %cst_31 [1] : vector<8x8xf32> to vector<8xf32>
    %49 = vector.shape_cast %48 : vector<8xf32> to vector<8x1xf32>
    %50 = arith.maximumf %47, %49 : vector<8x1xf32>
    %51 = arith.subf %47, %50 : vector<8x1xf32>
    %52 = math.exp %51 : vector<8x1xf32>
    %53 = vector.broadcast %50 : vector<8x1xf32> to vector<8x8xf32>
    %54 = arith.subf %45, %53 : vector<8x8xf32>
    %55 = math.exp %54 : vector<8x8xf32>
    %c1_32 = arith.constant 1 : index
    %c0_33 = arith.constant 0 : index
    %c0_34 = arith.constant 0 : index
    %56 = vector.load %arg8[%c1_32, %c0_33, %c0_34] : memref<4x8x1xf32, #tpu.memory_space<vmem>>, vector<1x8x1xf32>
    %57 = vector.shape_cast %56 : vector<1x8x1xf32> to vector<8x1xf32>
    %58 = arith.mulf %52, %57 : vector<8x1xf32>
    %cst_35 = arith.constant dense<0.000000e+00> : vector<8xf32>
    %59 = vector.multi_reduction <add>, %55, %cst_35 [1] : vector<8x8xf32> to vector<8xf32>
    %60 = vector.shape_cast %59 : vector<8xf32> to vector<8x1xf32>
    %61 = arith.addf %58, %60 : vector<8x1xf32>
    %c1_36 = arith.constant 1 : index
    %c0_37 = arith.constant 0 : index
    %c0_38 = arith.constant 0 : index
    %62 = vector.load %arg8[%c1_36, %c0_37, %c0_38] : memref<4x8x1xf32, #tpu.memory_space<vmem>>, vector<1x8x1xf32>
    %63 = vector.shape_cast %62 : vector<1x8x1xf32> to vector<8x1xf32>
    %64 = vector.shape_cast %61 : vector<8x1xf32> to vector<1x8x1xf32>
    tpu.vector_store %arg8[%c1_36, %c0_37, %c0_38], %64 {strides = array<i32>} : memref<4x8x1xf32, #tpu.memory_space<vmem>>, vector<1x8x1xf32>,
    %65 = arith.truncf %55 : vector<8x8xf32> to vector<8x8xbf16>
    %cst_39 = arith.constant dense<0.000000e+00> : vector<8x32xf32>
    %66 = tpu.matmul %65, %44, %cst_39 {dimension_numbers = #tpu.dot_dimension_numbers<[1], [0], [0], [1], [0, 0, 1, 1], [], []>} : vector<8x8xbf16>, vector<8x32xbf16>, vector<8x32xf32> -> vector<8x32xf32>
    %c0_40 = arith.constant 0 : index
    %c32 = arith.constant 32 : index
    %67 = vector.load %arg9[%c0_40, %c32] : memref<8x128xf32, #tpu.memory_space<vmem>>, vector<8x32xf32>
    %68 = vector.broadcast %52 : vector<8x1xf32> to vector<8x32xf32>
    %69 = arith.mulf %68, %67 : vector<8x32xf32>
    %70 = arith.addf %69, %66 : vector<8x32xf32>
    %c0_41 = arith.constant 0 : index
    %c32_42 = arith.constant 32 : index
    %71 = vector.load %arg9[%c0_41, %c32_42] : memref<8x128xf32, #tpu.memory_space<vmem>>, vector<8x32xf32>
    tpu.vector_store %arg9[%c0_41, %c32_42], %70 {strides = array<i32>} : memref<8x128xf32, #tpu.memory_space<vmem>>, vector<8x32xf32>,
    %c1_43 = arith.constant 1 : index
    %c0_44 = arith.constant 0 : index
    %c0_45 = arith.constant 0 : index
    %72 = vector.load %arg7[%c1_43, %c0_44, %c0_45] : memref<4x8x1xf32, #tpu.memory_space<vmem>>, vector<1x8x1xf32>
    %73 = vector.shape_cast %72 : vector<1x8x1xf32> to vector<8x1xf32>
    %74 = vector.shape_cast %50 : vector<8x1xf32> to vector<1x8x1xf32>
    tpu.vector_store %arg7[%c1_43, %c0_44, %c0_45], %74 {strides = array<i32>} : memref<4x8x1xf32, #tpu.memory_space<vmem>>, vector<1x8x1xf32>,
    %75 = vector.extract_strided_slice %4 {offsets = [0, 64], sizes = [8, 32], strides = [1, 1]} : vector<8x128xbf16> to vector<8x32xbf16>
    %76 = vector.extract_strided_slice %6 {offsets = [0, 64], sizes = [8, 32], strides = [1, 1]} : vector<8x128xbf16> to vector<8x32xbf16>
    %77 = vector.extract_strided_slice %8 {offsets = [0, 64], sizes = [8, 32], strides = [1, 1]} : vector<8x128xbf16> to vector<8x32xbf16>
    %cst_46 = arith.constant dense<0.000000e+00> : vector<8x8xf32>
    %78 = tpu.matmul %75, %76, %cst_46 {dimension_numbers = #tpu.dot_dimension_numbers<[1], [1], [0], [0], [0, 0, 1, 0], [], []>} : vector<8x32xbf16>, vector<8x32xbf16>, vector<8x8xf32> -> vector<8x8xf32>
    %c2 = arith.constant 2 : index
    %c0_47 = arith.constant 0 : index
    %c0_48 = arith.constant 0 : index
    %79 = vector.load %arg7[%c2, %c0_47, %c0_48] : memref<4x8x1xf32, #tpu.memory_space<vmem>>, vector<1x8x1xf32>
    %80 = vector.shape_cast %79 : vector<1x8x1xf32> to vector<8x1xf32>
    %cst_49 = arith.constant dense<0xFF800000> : vector<8xf32>
    %81 = vector.multi_reduction <maximumf>, %78, %cst_49 [1] : vector<8x8xf32> to vector<8xf32>
    %82 = vector.shape_cast %81 : vector<8xf32> to vector<8x1xf32>
    %83 = arith.maximumf %80, %82 : vector<8x1xf32>
    %84 = arith.subf %80, %83 : vector<8x1xf32>
    %85 = math.exp %84 : vector<8x1xf32>
    %86 = vector.broadcast %83 : vector<8x1xf32> to vector<8x8xf32>
    %87 = arith.subf %78, %86 : vector<8x8xf32>
    %88 = math.exp %87 : vector<8x8xf32>
    %c2_50 = arith.constant 2 : index
    %c0_51 = arith.constant 0 : index
    %c0_52 = arith.constant 0 : index
    %89 = vector.load %arg8[%c2_50, %c0_51, %c0_52] : memref<4x8x1xf32, #tpu.memory_space<vmem>>, vector<1x8x1xf32>
    %90 = vector.shape_cast %89 : vector<1x8x1xf32> to vector<8x1xf32>
    %91 = arith.mulf %85, %90 : vector<8x1xf32>
    %cst_53 = arith.constant dense<0.000000e+00> : vector<8xf32>
    %92 = vector.multi_reduction <add>, %88, %cst_53 [1] : vector<8x8xf32> to vector<8xf32>
    %93 = vector.shape_cast %92 : vector<8xf32> to vector<8x1xf32>
    %94 = arith.addf %91, %93 : vector<8x1xf32>
    %c2_54 = arith.constant 2 : index
    %c0_55 = arith.constant 0 : index
    %c0_56 = arith.constant 0 : index
    %95 = vector.load %arg8[%c2_54, %c0_55, %c0_56] : memref<4x8x1xf32, #tpu.memory_space<vmem>>, vector<1x8x1xf32>
    %96 = vector.shape_cast %95 : vector<1x8x1xf32> to vector<8x1xf32>
    %97 = vector.shape_cast %94 : vector<8x1xf32> to vector<1x8x1xf32>
    tpu.vector_store %arg8[%c2_54, %c0_55, %c0_56], %97 {strides = array<i32>} : memref<4x8x1xf32, #tpu.memory_space<vmem>>, vector<1x8x1xf32>,
    %98 = arith.truncf %88 : vector<8x8xf32> to vector<8x8xbf16>
    %cst_57 = arith.constant dense<0.000000e+00> : vector<8x32xf32>
    %99 = tpu.matmul %98, %77, %cst_57 {dimension_numbers = #tpu.dot_dimension_numbers<[1], [0], [0], [1], [0, 0, 1, 1], [], []>} : vector<8x8xbf16>, vector<8x32xbf16>, vector<8x32xf32> -> vector<8x32xf32>
    %c0_58 = arith.constant 0 : index
    %c64 = arith.constant 64 : index
    %100 = vector.load %arg9[%c0_58, %c64] : memref<8x128xf32, #tpu.memory_space<vmem>>, vector<8x32xf32>
    %101 = vector.broadcast %85 : vector<8x1xf32> to vector<8x32xf32>
    %102 = arith.mulf %101, %100 : vector<8x32xf32>
    %103 = arith.addf %102, %99 : vector<8x32xf32>
    %c0_59 = arith.constant 0 : index
    %c64_60 = arith.constant 64 : index
    %104 = vector.load %arg9[%c0_59, %c64_60] : memref<8x128xf32, #tpu.memory_space<vmem>>, vector<8x32xf32>
    tpu.vector_store %arg9[%c0_59, %c64_60], %103 {strides = array<i32>} : memref<8x128xf32, #tpu.memory_space<vmem>>, vector<8x32xf32>,
    %c2_61 = arith.constant 2 : index
    %c0_62 = arith.constant 0 : index
    %c0_63 = arith.constant 0 : index
    %105 = vector.load %arg7[%c2_61, %c0_62, %c0_63] : memref<4x8x1xf32, #tpu.memory_space<vmem>>, vector<1x8x1xf32>
    %106 = vector.shape_cast %105 : vector<1x8x1xf32> to vector<8x1xf32>
    %107 = vector.shape_cast %83 : vector<8x1xf32> to vector<1x8x1xf32>
    tpu.vector_store %arg7[%c2_61, %c0_62, %c0_63], %107 {strides = array<i32>} : memref<4x8x1xf32, #tpu.memory_space<vmem>>, vector<1x8x1xf32>,
    %108 = vector.extract_strided_slice %4 {offsets = [0, 96], sizes = [8, 32], strides = [1, 1]} : vector<8x128xbf16> to vector<8x32xbf16>
    %109 = vector.extract_strided_slice %6 {offsets = [0, 96], sizes = [8, 32], strides = [1, 1]} : vector<8x128xbf16> to vector<8x32xbf16>
    %110 = vector.extract_strided_slice %8 {offsets = [0, 96], sizes = [8, 32], strides = [1, 1]} : vector<8x128xbf16> to vector<8x32xbf16>
    %cst_64 = arith.constant dense<0.000000e+00> : vector<8x8xf32>
    %111 = tpu.matmul %108, %109, %cst_64 {dimension_numbers = #tpu.dot_dimension_numbers<[1], [1], [0], [0], [0, 0, 1, 0], [], []>} : vector<8x32xbf16>, vector<8x32xbf16>, vector<8x8xf32> -> vector<8x8xf32>
    %c3 = arith.constant 3 : index
    %c0_65 = arith.constant 0 : index
    %c0_66 = arith.constant 0 : index
    %112 = vector.load %arg7[%c3, %c0_65, %c0_66] : memref<4x8x1xf32, #tpu.memory_space<vmem>>, vector<1x8x1xf32>
    %113 = vector.shape_cast %112 : vector<1x8x1xf32> to vector<8x1xf32>
    %cst_67 = arith.constant dense<0xFF800000> : vector<8xf32>
    %114 = vector.multi_reduction <maximumf>, %111, %cst_67 [1] : vector<8x8xf32> to vector<8xf32>
    %115 = vector.shape_cast %114 : vector<8xf32> to vector<8x1xf32>
    %116 = arith.maximumf %113, %115 : vector<8x1xf32>
    %117 = arith.subf %113, %116 : vector<8x1xf32>
    %118 = math.exp %117 : vector<8x1xf32>
    %119 = vector.broadcast %116 : vector<8x1xf32> to vector<8x8xf32>
    %120 = arith.subf %111, %119 : vector<8x8xf32>
    %121 = math.exp %120 : vector<8x8xf32>
    %c3_68 = arith.constant 3 : index
    %c0_69 = arith.constant 0 : index
    %c0_70 = arith.constant 0 : index
    %122 = vector.load %arg8[%c3_68, %c0_69, %c0_70] : memref<4x8x1xf32, #tpu.memory_space<vmem>>, vector<1x8x1xf32>
    %123 = vector.shape_cast %122 : vector<1x8x1xf32> to vector<8x1xf32>
    %124 = arith.mulf %118, %123 : vector<8x1xf32>
    %cst_71 = arith.constant dense<0.000000e+00> : vector<8xf32>
    %125 = vector.multi_reduction <add>, %121, %cst_71 [1] : vector<8x8xf32> to vector<8xf32>
    %126 = vector.shape_cast %125 : vector<8xf32> to vector<8x1xf32>
    %127 = arith.addf %124, %126 : vector<8x1xf32>
    %c3_72 = arith.constant 3 : index
    %c0_73 = arith.constant 0 : index
    %c0_74 = arith.constant 0 : index
    %128 = vector.load %arg8[%c3_72, %c0_73, %c0_74] : memref<4x8x1xf32, #tpu.memory_space<vmem>>, vector<1x8x1xf32>
    %129 = vector.shape_cast %128 : vector<1x8x1xf32> to vector<8x1xf32>
    %130 = vector.shape_cast %127 : vector<8x1xf32> to vector<1x8x1xf32>
    tpu.vector_store %arg8[%c3_72, %c0_73, %c0_74], %130 {strides = array<i32>} : memref<4x8x1xf32, #tpu.memory_space<vmem>>, vector<1x8x1xf32>,
    %131 = arith.truncf %121 : vector<8x8xf32> to vector<8x8xbf16>
    %cst_75 = arith.constant dense<0.000000e+00> : vector<8x32xf32>
    %132 = tpu.matmul %131, %110, %cst_75 {dimension_numbers = #tpu.dot_dimension_numbers<[1], [0], [0], [1], [0, 0, 1, 1], [], []>} : vector<8x8xbf16>, vector<8x32xbf16>, vector<8x32xf32> -> vector<8x32xf32>
    %c0_76 = arith.constant 0 : index
    %c96 = arith.constant 96 : index
    %133 = vector.load %arg9[%c0_76, %c96] : memref<8x128xf32, #tpu.memory_space<vmem>>, vector<8x32xf32>
    %134 = vector.broadcast %118 : vector<8x1xf32> to vector<8x32xf32>
    %135 = arith.mulf %134, %133 : vector<8x32xf32>
    %136 = arith.addf %135, %132 : vector<8x32xf32>
    %c0_77 = arith.constant 0 : index
    %c96_78 = arith.constant 96 : index
    %137 = vector.load %arg9[%c0_77, %c96_78] : memref<8x128xf32, #tpu.memory_space<vmem>>, vector<8x32xf32>
    tpu.vector_store %arg9[%c0_77, %c96_78], %136 {strides = array<i32>} : memref<8x128xf32, #tpu.memory_space<vmem>>, vector<8x32xf32>,
    %c3_79 = arith.constant 3 : index
    %c0_80 = arith.constant 0 : index
    %c0_81 = arith.constant 0 : index
    %138 = vector.load %arg7[%c3_79, %c0_80, %c0_81] : memref<4x8x1xf32, #tpu.memory_space<vmem>>, vector<1x8x1xf32>
    %139 = vector.shape_cast %138 : vector<1x8x1xf32> to vector<8x1xf32>
    %140 = vector.shape_cast %116 : vector<8x1xf32> to vector<1x8x1xf32>
    tpu.vector_store %arg7[%c3_79, %c0_80, %c0_81], %140 {strides = array<i32>} : memref<4x8x1xf32, #tpu.memory_space<vmem>>, vector<1x8x1xf32>,
    %c0_i32_82 = arith.constant 0 : i32
    %141 = arith.cmpi eq, %arg2, %c0_i32_82 : i32
    %142 = arith.extui %141 : i1 to i32
    %c0_i32_83 = arith.constant 0 : i32
    %143 = arith.cmpi ne, %142, %c0_i32_83 : i32
    scf.if %143 {
      %c0_84 = arith.constant 0 : index
      %c0_85 = arith.constant 0 : index
      %c0_86 = arith.constant 0 : index
      %144 = vector.load %arg8[%c0_84, %c0_85, %c0_86] : memref<4x8x1xf32, #tpu.memory_space<vmem>>, vector<1x8x1xf32>
      %145 = vector.shape_cast %144 : vector<1x8x1xf32> to vector<8x1xf32>
      %146 = tpu.reciprocal %145 {approx = true} : vector<8x1xf32> -> vector<8x1xf32>
      %c0_87 = arith.constant 0 : index
      %c0_88 = arith.constant 0 : index
      %147 = vector.load %arg9[%c0_87, %c0_88] : memref<8x128xf32, #tpu.memory_space<vmem>>, vector<8x32xf32>
      %148 = vector.broadcast %146 : vector<8x1xf32> to vector<8x32xf32>
      %149 = arith.mulf %147, %148 : vector<8x32xf32>
      %c0_89 = arith.constant 0 : index
      %c0_90 = arith.constant 0 : index
      %150 = vector.load %arg9[%c0_89, %c0_90] : memref<8x128xf32, #tpu.memory_space<vmem>>, vector<8x32xf32>
      tpu.vector_store %arg9[%c0_89, %c0_90], %149 {strides = array<i32>} : memref<8x128xf32, #tpu.memory_space<vmem>>, vector<8x32xf32>,
      %c1_91 = arith.constant 1 : index
      %c0_92 = arith.constant 0 : index
      %c0_93 = arith.constant 0 : index
      %151 = vector.load %arg8[%c1_91, %c0_92, %c0_93] : memref<4x8x1xf32, #tpu.memory_space<vmem>>, vector<1x8x1xf32>
      %152 = vector.shape_cast %151 : vector<1x8x1xf32> to vector<8x1xf32>
      %153 = tpu.reciprocal %152 {approx = true} : vector<8x1xf32> -> vector<8x1xf32>
      %c0_94 = arith.constant 0 : index
      %c32_95 = arith.constant 32 : index
      %154 = vector.load %arg9[%c0_94, %c32_95] : memref<8x128xf32, #tpu.memory_space<vmem>>, vector<8x32xf32>
      %155 = vector.broadcast %153 : vector<8x1xf32> to vector<8x32xf32>
      %156 = arith.mulf %154, %155 : vector<8x32xf32>
      %c0_96 = arith.constant 0 : index
      %c32_97 = arith.constant 32 : index
      %157 = vector.load %arg9[%c0_96, %c32_97] : memref<8x128xf32, #tpu.memory_space<vmem>>, vector<8x32xf32>
      tpu.vector_store %arg9[%c0_96, %c32_97], %156 {strides = array<i32>} : memref<8x128xf32, #tpu.memory_space<vmem>>, vector<8x32xf32>,
      %c2_98 = arith.constant 2 : index
      %c0_99 = arith.constant 0 : index
      %c0_100 = arith.constant 0 : index
      %158 = vector.load %arg8[%c2_98, %c0_99, %c0_100] : memref<4x8x1xf32, #tpu.memory_space<vmem>>, vector<1x8x1xf32>
      %159 = vector.shape_cast %158 : vector<1x8x1xf32> to vector<8x1xf32>
      %160 = tpu.reciprocal %159 {approx = true} : vector<8x1xf32> -> vector<8x1xf32>
      %c0_101 = arith.constant 0 : index
      %c64_102 = arith.constant 64 : index
      %161 = vector.load %arg9[%c0_101, %c64_102] : memref<8x128xf32, #tpu.memory_space<vmem>>, vector<8x32xf32>
      %162 = vector.broadcast %160 : vector<8x1xf32> to vector<8x32xf32>
      %163 = arith.mulf %161, %162 : vector<8x32xf32>
      %c0_103 = arith.constant 0 : index
      %c64_104 = arith.constant 64 : index
      %164 = vector.load %arg9[%c0_103, %c64_104] : memref<8x128xf32, #tpu.memory_space<vmem>>, vector<8x32xf32>
      tpu.vector_store %arg9[%c0_103, %c64_104], %163 {strides = array<i32>} : memref<8x128xf32, #tpu.memory_space<vmem>>, vector<8x32xf32>,
      %c3_105 = arith.constant 3 : index
      %c0_106 = arith.constant 0 : index
      %c0_107 = arith.constant 0 : index
      %165 = vector.load %arg8[%c3_105, %c0_106, %c0_107] : memref<4x8x1xf32, #tpu.memory_space<vmem>>, vector<1x8x1xf32>
      %166 = vector.shape_cast %165 : vector<1x8x1xf32> to vector<8x1xf32>
      %167 = tpu.reciprocal %166 {approx = true} : vector<8x1xf32> -> vector<8x1xf32>
      %c0_108 = arith.constant 0 : index
      %c96_109 = arith.constant 96 : index
      %168 = vector.load %arg9[%c0_108, %c96_109] : memref<8x128xf32, #tpu.memory_space<vmem>>, vector<8x32xf32>
      %169 = vector.broadcast %167 : vector<8x1xf32> to vector<8x32xf32>
      %170 = arith.mulf %168, %169 : vector<8x32xf32>
      %c0_110 = arith.constant 0 : index
      %c96_111 = arith.constant 96 : index
      %171 = vector.load %arg9[%c0_110, %c96_111] : memref<8x128xf32, #tpu.memory_space<vmem>>, vector<8x32xf32>
      tpu.vector_store %arg9[%c0_110, %c96_111], %170 {strides = array<i32>} : memref<8x128xf32, #tpu.memory_space<vmem>>, vector<8x32xf32>,
      %c0_112 = arith.constant 0 : index
      %c0_113 = arith.constant 0 : index
      %172 = vector.load %arg9[%c0_112, %c0_113] : memref<8x128xf32, #tpu.memory_space<vmem>>, vector<8x128xf32>
      %173 = arith.truncf %172 : vector<8x128xf32> to vector<8x128xbf16>
      %c0_114 = arith.constant 0 : index
      %c0_115 = arith.constant 0 : index
      %c0_116 = arith.constant 0 : index
      %174 = vector.load %arg6[%c0_114, %c0_115, %c0_116] : memref<1x8x128xbf16, #tpu.memory_space<vmem>>, vector<1x8x128xbf16>
      %175 = vector.shape_cast %174 : vector<1x8x128xbf16> to vector<8x128xbf16>
      %176 = vector.shape_cast %173 : vector<8x128xbf16> to vector<1x8x128xbf16>
      tpu.vector_store %arg6[%c0_114, %c0_115, %c0_116], %176 {strides = array<i32>} : memref<1x8x128xbf16, #tpu.memory_space<vmem>>, vector<1x8x128xbf16>,
    } else {
    }
    return
  }
  func.func @transform_0(%arg0: i32, %arg1: i32, %arg2: i32) -> (i32, i32, i32) {
    %c0_i32 = arith.constant 0 : i32
    %c0_i32_0 = arith.constant 0 : i32
    return %arg0, %arg1, %c0_i32 : i32, i32, i32
  }
  func.func @transform_1(%arg0: i32, %arg1: i32, %arg2: i32) -> (i32, i32, i32) {
    %c1_i32 = arith.constant 1 : i32
    %c0_i32 = arith.constant 0 : i32
    return %arg0, %arg2, %c1_i32 : i32, i32, i32
  }
  func.func @transform_2(%arg0: i32, %arg1: i32, %arg2: i32) -> (i32, i32, i32) {
    %c2_i32 = arith.constant 2 : i32
    %c0_i32 = arith.constant 0 : i32
    return %arg0, %arg2, %c2_i32 : i32, i32, i32
  }
  func.func @transform_3(%arg0: i32, %arg1: i32, %arg2: i32) -> (i32, i32, i32) {
    %c0_i32 = arith.constant 0 : i32
    %c0_i32_0 = arith.constant 0 : i32
    return %arg0, %arg1, %c0_i32 : i32, i32, i32
  }
}

module attributes {stable_mosaic.version = 11 : i64} {
  func.func @_linear_kernel_full_k(%arg0: i32, %arg1: i32, %arg2: i32, %arg3: memref<1x16x128xbf16, #tpu.memory_space<vmem>>, %arg4: memref<1x128x384xbf16, #tpu.memory_space<vmem>>, %arg5: memref<1x1x384xf32, #tpu.memory_space<vmem>>, %arg6: memref<1x16x384xbf16, #tpu.memory_space<vmem>>) attributes {dimension_semantics = [#tpu.dimension_semantics<parallel>, #tpu.dimension_semantics<parallel>, #tpu.dimension_semantics<parallel>], iteration_bounds = array<i64: 1, 1, 1>, scalar_prefetch = 0 : i64, scratch_operands = 0 : i64, tpu.core_type = #tpu.core_type<tc>, window_params = [{transform_indices = @transform_0, window_bounds = array<i64: 1, 16, 128>}, {transform_indices = @transform_1, window_bounds = array<i64: 1, 128, 384>}, {transform_indices = @transform_2, window_bounds = array<i64: 1, 1, 384>}, {transform_indices = @transform_3, window_bounds = array<i64: 1, 16, 384>}]} {
    %c0 = arith.constant 0 : index
    %c0_0 = arith.constant 0 : index
    %c0_1 = arith.constant 0 : index
    %0 = vector.load %arg3[%c0, %c0_0, %c0_1] : memref<1x16x128xbf16, #tpu.memory_space<vmem>>, vector<1x16x128xbf16>
    %1 = vector.shape_cast %0 : vector<1x16x128xbf16> to vector<16x128xbf16>
    %c0_2 = arith.constant 0 : index
    %c0_3 = arith.constant 0 : index
    %c0_4 = arith.constant 0 : index
    %2 = vector.load %arg4[%c0_2, %c0_3, %c0_4] : memref<1x128x384xbf16, #tpu.memory_space<vmem>>, vector<1x128x384xbf16>
    %3 = vector.shape_cast %2 : vector<1x128x384xbf16> to vector<128x384xbf16>
    %cst = arith.constant dense<0.000000e+00> : vector<16x384xf32>
    %4 = tpu.matmul %1, %3, %cst {dimension_numbers = #tpu.dot_dimension_numbers<[1], [0], [0], [1], [0, 0, 1, 1], [], []>} : vector<16x128xbf16>, vector<128x384xbf16>, vector<16x384xf32> -> vector<16x384xf32>
    %c0_5 = arith.constant 0 : index
    %c0_6 = arith.constant 0 : index
    %c0_7 = arith.constant 0 : index
    %5 = vector.load %arg5[%c0_5, %c0_6, %c0_7] : memref<1x1x384xf32, #tpu.memory_space<vmem>>, vector<1x1x384xf32>
    %6 = vector.shape_cast %5 : vector<1x1x384xf32> to vector<1x384xf32>
    %7 = vector.broadcast %6 : vector<1x384xf32> to vector<16x384xf32>
    %8 = arith.addf %4, %7 : vector<16x384xf32>
    %9 = arith.truncf %8 : vector<16x384xf32> to vector<16x384xbf16>
    %c0_8 = arith.constant 0 : index
    %c0_9 = arith.constant 0 : index
    %c0_10 = arith.constant 0 : index
    %10 = vector.load %arg6[%c0_8, %c0_9, %c0_10] : memref<1x16x384xbf16, #tpu.memory_space<vmem>>, vector<1x16x384xbf16>
    %11 = vector.shape_cast %10 : vector<1x16x384xbf16> to vector<16x384xbf16>
    %12 = vector.shape_cast %9 : vector<16x384xbf16> to vector<1x16x384xbf16>
    tpu.vector_store %arg6[%c0_8, %c0_9, %c0_10], %12 {strides = array<i32>} : memref<1x16x384xbf16, #tpu.memory_space<vmem>>, vector<1x16x384xbf16>,
    return
  }
  func.func @transform_0(%arg0: i32, %arg1: i32, %arg2: i32) -> (i32, i32, i32) {
    %c0_i32 = arith.constant 0 : i32
    %c0_i32_0 = arith.constant 0 : i32
    return %arg0, %arg1, %c0_i32 : i32, i32, i32
  }
  func.func @transform_1(%arg0: i32, %arg1: i32, %arg2: i32) -> (i32, i32, i32) {
    %c0_i32 = arith.constant 0 : i32
    %c0_i32_0 = arith.constant 0 : i32
    return %arg0, %c0_i32, %arg2 : i32, i32, i32
  }
  func.func @transform_2(%arg0: i32, %arg1: i32, %arg2: i32) -> (i32, i32, i32) {
    %c0_i32 = arith.constant 0 : i32
    %c0_i32_0 = arith.constant 0 : i32
    return %arg0, %c0_i32, %arg2 : i32, i32, i32
  }
  func.func @transform_3(%arg0: i32, %arg1: i32, %arg2: i32) -> (i32, i32, i32) {
    %c0_i32 = arith.constant 0 : i32
    return %arg0, %arg1, %arg2 : i32, i32, i32
  }
}

</mosaic_0001>

<bundles_post_ra>
// kernel: mha_self_attention.5
= control target key start
LH: loop header
LB: loop body
LE: loop exit
PB: predicated region body
PF: predicated region fallthrough
CT: control target
= control target key end

     0   :  { %v231_v1 = vmov 0.0   ;;  %vm232_vm0 = vmmov 0   ;;  %s298_s0 = inlined_call_operand.vmem [shape: bf16[1,16,128], index: 0, kind: input, shape index: {}]   ;;  %s299_s1 = inlined_call_operand.vmem [shape: bf16[1,128,128], index: 1, kind: input, shape index: {}]   ;;  %s300_s2 = inlined_call_operand.vmem [shape: f32[1,1,128], index: 2, kind: input, shape index: {}]   ;;  %s301_s3 = inlined_call_operand.hbm [shape: f32[1,16,128], index: 3, kind: output, shape index: {}]  }
   0x1   :  { %v198_v0 = vld [vmem:[%s299_s1] sm:$0xff]   ;;  %173 = vmatprep.subr.bf16.mxu0 %v231_v1  ;;  %v199_v2 = vld [vmem:[%s299_s1 + $0x8] sm:$0xff]   ;;  %189 = vmatprep.mubr.msk.bf16.mxu0 %vm232_vm0, %v231_v1  ;;  %v200_v3 = vld [vmem:[%s299_s1 + $0x10] sm:$0xff]  }
   0x2   :  { %174 = vmatpush3.bf16.msra.mxu0 %v198_v0 }
   0x3   :  { %175 = vmatprep.subr.bf16.mxu0 %v231_v1 }
   0x6   :  { %176 = vmatpush3.bf16.msra.mxu0 %v199_v2 }
   0x7   :  { %177 = vmatprep.subr.bf16.mxu0 %v231_v1 }
   0x8   :  { %8 = vsyncpa [#allocation3], 0  ;;  %v201_v4 = vld [vmem:[%s299_s1 + $0x18] sm:$0xff]   ;;  %v202_v5 = vld [vmem:[%s299_s1 + $0x20] sm:$0xff]   ;;  %s233_s5 = smov [#allocation2]  }
   0x9   :  { %v203_v6 = vld [vmem:[%s299_s1 + $0x28] sm:$0xff]   ;;  %v204_v7 = vld [vmem:[%s299_s1 + $0x30] sm:$0xff]   ;;  %v205_v8 = vld [vmem:[%s299_s1 + $0x38] sm:$0xff]   ;;  %s143_s6 = sshll.u32 %s233_s5, 4  ;;  %s144_s6 = int_to_ptr.vmem [resolvable:$true] %s143_s6 }
   0xa   :  { %178 = vmatpush3.bf16.msra.mxu0 %v200_v3  ;;  %v206_v9 = vld [vmem:[%s298_s0] sm:$0xff]   ;;  %s207_s1 = scalar_lea.vmem %s144_s6, 256  ;;  %p212_p1 = scmp.lt.s32.totalorder %s144_s6, %s144_s6 }
   0xb   :  { %179 = vmatprep.subr.bf16.mxu0 %v231_v1  ;;  %v154_v10 = vld [vmem:[%s300_s2] ss:$0 sm:$0xff]  ;;  %p208_p0 = scmp.ne.s32.totalorder %s144_s6, %s207_s1  ;;  %p213_p2 = scmp.lt.s32.totalorder %s207_s1, %s207_s1 }
   0xd   :  { %p214_p3 = por %p213_p2, %p212_p1 }
   0xe   :  { %180 = vmatpush3.bf16.msra.mxu0 %v201_v4 }
   0xf   :  { %181 = vmatprep.subr.bf16.mxu0 %v231_v1  ;;  %p215_p4 = pnand %p214_p3, %p208_p0 }
  0x12   :  { %182 = vmatpush3.bf16.msra.mxu0 %v202_v5 }
  0x13   :  { %183 = vmatprep.subr.bf16.mxu0 %v231_v1 }
  0x16   :  { %184 = vmatpush3.bf16.msra.mxu0 %v203_v6 }
  0x17   :  { %185 = vmatprep.subr.bf16.mxu0 %v231_v1 }
  0x1a   :  { %186 = vmatpush3.bf16.msra.mxu0 %v204_v7 }
  0x1b   :  { %187 = vmatprep.subr.bf16.mxu0 %v231_v1 }
  0x1e   :  { %188 = vmatpush3.bf16.msra.mxu0 %v205_v8 }
  0x21   :  { %190 = vmatmul.mubr.bf16.vlgmr.msra.gmra.mrb[0].mxu0 %v206_v9 }
  0xf4   :  { %v129_v11 = vpop.f32.mrb[0].mxu0 }
  0xf5   :  { %v130_v12 = vadd.f32 %v154_v10, %v129_v11  ;;  %v191_v13 = vpop.f32.mrb[1].mxu0 }
  0xf6   :  { %v132_v14 = vpop.f32.mrb[2].mxu0 }
  0xf7   :  { %136 = vst [vmem:[#allocation2] sm:$0xff] %v130_v12  ;;  %v133_v15 = vadd.f32 %v154_v10, %v132_v14  ;;  %v192_v16 = vpop.f32.mrb[3].mxu0 }
  0xf9   :  { %137 = vst [vmem:[#allocation2 + $0x8] sm:$0xff] %v133_v15 }
  0xfa   :  { %218 = shalt.err (!%p215_p4)
}
  0xfb   :  { %s219_s7 = scalar_lea.hbm %s301_s3, 256 }
  0xfc   :  { %p220_p5 = scmp.ne.s32.totalorder %s301_s3, %s219_s7  ;;  %p223_p6 = scmp.lt.u32.totalorder %s219_s7, %s301_s3 }
  0xfe   :  { %p225_p7 = pnand %p223_p6, %p220_p5 }
 0x100   :  { %228 = shalt.err (!%p225_p7)
}
 0x101   :  { %s234_s12 = smov 128   ;;  %s235_s13 = smov 8  }
 0x102   :  { %149 = dma.vmem_to_hbm [thread:$0]  %s144_s6, 256, %s301_s3, [#allocation3], %s234_s12, %s234_s12, %s235_s13  }
 0x103   :  { %229 = dma.done.wait [#allocation3], 256  }
 0x104   :  { %230 = vsyncadd [#allocation3], 4294967040 }
 0x105   :  { %153 = vsyncpa [#allocation3], 1 }

// kernel: mha_self_attention.3
= control target key start
LH: loop header
LB: loop body
LE: loop exit
PB: predicated region body
PF: predicated region fallthrough
CT: control target
= control target key end

     0   :  { %8 = vsyncpa [#allocation3], 0  ;;  %s452_s12 = smov [#allocation2]   ;;  %s508_s0 = inlined_call_operand.vmem [shape: bf16[1,16,128], index: 0, kind: input, shape index: {}]   ;;  %s509_s1 = inlined_call_operand.hbm [shape: bf16[1,128,384], index: 1, kind: input, shape index: {}]   ;;  %s510_s2 = inlined_call_operand.vmem [shape: f32[1,1,384], index: 2, kind: input, shape index: {}]   ;;  %s511_s3 = inlined_call_operand.vmem [shape: bf16[1,16,384], index: 3, kind: output, shape index: {}]  }
   0x1   :  { %s16_s13 = sshll.u32 %s452_s12, 4  ;;  %s428_s16 = scalar_lea.hbm %s509_s1, 3072  ;;  %s17_s13 = int_to_ptr.vmem [resolvable:$true] %s16_s13 }
   0x2   :  { %p429_p0 = scmp.ne.s32.totalorder %s509_s1, %s428_s16  ;;  %p432_p1 = scmp.lt.u32.totalorder %s428_s16, %s509_s1 }
   0x4   :  { %p434_p2 = pnand %p432_p1, %p429_p0 }
   0x6   :  { %437 = shalt.err (!%p434_p2)
}
   0x7   :  { %s438_s21 = scalar_lea.vmem %s17_s13, 3072  ;;  %p443_p4 = scmp.lt.s32.totalorder %s17_s13, %s17_s13 }
   0x8   :  { %p439_p3 = scmp.ne.s32.totalorder %s17_s13, %s438_s21  ;;  %p444_p5 = scmp.lt.s32.totalorder %s438_s21, %s438_s21 }
   0xa   :  { %p445_p6 = por %p444_p5, %p443_p4 }
   0xc   :  { %p446_p7 = pnand %p445_p6, %p439_p3 }
   0xe   :  { %449 = shalt.err (!%p446_p7)
}
   0xf   :  { %s453_s22 = smov 192   ;;  %s454_s23 = smov 12  }
  0x10   :  { %22 = dma.hbm_to_vmem [thread:$0]  %s509_s1, 3072, %s17_s13, [#allocation3], %s453_s22, %s453_s22, %s454_s23  }
  0x11   :  { %450 = dma.done.wait [#allocation3], 3072  }
  0x12   :  { %451 = vsyncadd [#allocation3], 4294964224  ;;  %v455_v0 = vmov 0.0   ;;  %vm456_vm0 = vmmov 0   ;;  %v457_v1 = vmov 0   ;;  %v427_v26 = vld [vmem:[%s508_s0] sm:$0xff]   ;;  %v65_v27 = vlaneseq }
  0x13   :  { %369 = vmatprep.subr.bf16.mxu1 %v455_v0  ;;  %385 = vmatprep.mubr.msk.bf16.mxu1 %vm456_vm0, %v455_v0  ;;  %v395_v2 = vld [vmem:[#allocation2 + $0x4] ss:$12 sps:$4 sm:$0xff]   ;;  %v397_v3 = vld [vmem:[#allocation2 + $0x8] ss:$12 sps:$4 sm:$0xff]   ;;  %v398_v4 = vld [vmem:[#allocation2] ss:$12 sps:$4 sm:$0xff]  }
  0x14   :  { %246 = vmatprep.mubr.bf16.mxu0 %v457_v1  ;;  %214 = vmatprep.subr.bf16.mxu0 %v395_v2  ;;  %v399_v5 = vld [vmem:[#allocation2 + $0x1c] ss:$12 sps:$4 sm:$0xff]   ;;  %v401_v6 = vld [vmem:[#allocation2 + $0x20] ss:$12 sps:$4 sm:$0xff]   ;;  %v402_v7 = vld [vmem:[#allocation2 + $0x18] ss:$12 sps:$4 sm:$0xff]  }
  0x15   :  { %370 = vmatpush3.bf16.msra.mxu1 %v397_v3  ;;  %215 = vmatpush1.bf16.msra.mxu0 %v398_v4  ;;  %v403_v8 = vld [vmem:[#allocation2 + $0x34] ss:$12 sps:$4 sm:$0xff]   ;;  %v405_v9 = vld [vmem:[#allocation2 + $0x38] ss:$12 sps:$4 sm:$0xff]   ;;  %v406_v10 = vld [vmem:[#allocation2 + $0x30] ss:$12 sps:$4 sm:$0xff]  }
  0x16   :  { %371 = vmatprep.subr.bf16.mxu1 %v455_v0  ;;  %216 = vmatprep.subr.bf16.mxu0 %v399_v5  ;;  %v407_v11 = vld [vmem:[#allocation2 + $0x4c] ss:$12 sps:$4 sm:$0xff]   ;;  %v409_v12 = vld [vmem:[#allocation2 + $0x50] ss:$12 sps:$4 sm:$0xff]   ;;  %v410_v13 = vld [vmem:[#allocation2 + $0x48] ss:$12 sps:$4 sm:$0xff]  }
  0x17   :  { %v411_v14 = vld [vmem:[#allocation2 + $0x64] ss:$12 sps:$4 sm:$0xff]   ;;  %v413_v15 = vld [vmem:[#allocation2 + $0x68] ss:$12 sps:$4 sm:$0xff]   ;;  %v414_v16 = vld [vmem:[#allocation2 + $0x60] ss:$12 sps:$4 sm:$0xff]  }
  0x18   :  { %v415_v17 = vld [vmem:[#allocation2 + $0x7c] ss:$12 sps:$4 sm:$0xff]   ;;  %v417_v18 = vld [vmem:[#allocation2 + $0x80] ss:$12 sps:$4 sm:$0xff]   ;;  %v418_v19 = vld [vmem:[#allocation2 + $0x78] ss:$12 sps:$4 sm:$0xff]  }
  0x19   :  { %372 = vmatpush3.bf16.msra.mxu1 %v401_v6  ;;  %217 = vmatpush1.bf16.msra.mxu0 %v402_v7  ;;  %v419_v20 = vld [vmem:[#allocation2 + $0x94] ss:$12 sps:$4 sm:$0xff]   ;;  %v421_v21 = vld [vmem:[#allocation2 + $0x98] ss:$12 sps:$4 sm:$0xff]   ;;  %v422_v22 = vld [vmem:[#allocation2 + $0x90] ss:$12 sps:$4 sm:$0xff]  }
  0x1a   :  { %373 = vmatprep.subr.bf16.mxu1 %v455_v0  ;;  %218 = vmatprep.subr.bf16.mxu0 %v403_v8  ;;  %v423_v23 = vld [vmem:[#allocation2 + $0xac] ss:$12 sps:$4 sm:$0xff]   ;;  %v425_v24 = vld [vmem:[#allocation2 + $0xb0] ss:$12 sps:$4 sm:$0xff]   ;;  %v426_v25 = vld [vmem:[#allocation2 + $0xa8] ss:$12 sps:$4 sm:$0xff]  }
  0x1b   :  { %v66_v28 = vshrl.u32 %v65_v27, 7  ;;  %v63_v30 = vld [vmem:[%s510_s2] sm:$0x7] }
  0x1d   :  { %374 = vmatpush3.bf16.msra.mxu1 %v405_v9  ;;  %219 = vmatpush1.bf16.msra.mxu0 %v406_v10  ;;  %v75_v29 = vsub.s32 2, %v66_v28  ;;  %v67_v31 = vsub.s32 0, %v66_v28  ;;  %v71_v32 = vsub.s32 1, %v66_v28 }
  0x1e   :  { %375 = vmatprep.subr.bf16.mxu1 %v455_v0  ;;  %220 = vmatprep.subr.bf16.mxu0 %v407_v11 }
  0x1f   :  { %v76_v33 = vrot.slane %v63_v30, %v75_v29  ;;  %v68_v34 = vrot.slane %v63_v30, %v67_v31  ;;  %v72_v35 = vrot.slane %v63_v30, %v71_v32 }
  0x21   :  { %376 = vmatpush3.bf16.msra.mxu1 %v409_v12  ;;  %221 = vmatpush1.bf16.msra.mxu0 %v410_v13 }
  0x22   :  { %377 = vmatprep.subr.bf16.mxu1 %v455_v0  ;;  %222 = vmatprep.subr.bf16.mxu0 %v411_v14 }
  0x25   :  { %378 = vmatpush3.bf16.msra.mxu1 %v413_v15  ;;  %223 = vmatpush1.bf16.msra.mxu0 %v414_v16 }
  0x26   :  { %379 = vmatprep.subr.bf16.mxu1 %v455_v0  ;;  %224 = vmatprep.subr.bf16.mxu0 %v415_v17 }
  0x29   :  { %380 = vmatpush3.bf16.msra.mxu1 %v417_v18  ;;  %225 = vmatpush1.bf16.msra.mxu0 %v418_v19 }
  0x2a   :  { %381 = vmatprep.subr.bf16.mxu1 %v455_v0  ;;  %226 = vmatprep.subr.bf16.mxu0 %v419_v20 }
  0x2d   :  { %382 = vmatpush3.bf16.msra.mxu1 %v421_v21  ;;  %227 = vmatpush1.bf16.msra.mxu0 %v422_v22 }
  0x2e   :  { %383 = vmatprep.subr.bf16.mxu1 %v455_v0  ;;  %228 = vmatprep.subr.bf16.mxu0 %v423_v23 }
  0x31   :  { %384 = vmatpush3.bf16.msra.mxu1 %v425_v24  ;;  %229 = vmatpush1.bf16.msra.mxu0 %v426_v25 }
  0x34   :  { %386 = vmatmul.mubr.bf16.vlgmr.msra.gmra.mrb[0].mxu1 %v427_v26  ;;  %247 = vmatmul.mubr.bf16.vlgmr.msra.gmra.mrb[0].mxu0 %v427_v26 }
 0x107   :  { %v291_v36 = vpop.f32.mrb[0].mxu1  ;;  %v248_v38 = vpop.f32.mrb[0].mxu0 }
 0x108   :  { %v292_v37 = vadd.f32 %v291_v36, %v76_v33  ;;  %v387_v39 = vpop.f32.mrb[1].mxu1  ;;  %v249_v40 = vadd.f32 %v248_v38, %v68_v34  ;;  %v250_v41 = vpop.f32.mrb[1].mxu0 }
 0x109   :  { %v294_v42 = vpop.f32.mrb[2].mxu1  ;;  %v251_v44 = vadd.f32 %v250_v41, %v72_v35  ;;  %v252_v46 = vpop.f32.mrb[2].mxu0 }
 0x10a   :  { %v357_v43 = vpack.c.bf16 %v292_v37, %v292_v37  ;;  %v295_v45 = vadd.f32 %v294_v42, %v76_v33  ;;  %v388_v47 = vpop.f32.mrb[3].mxu1  ;;  %v253_v48 = vadd.f32 %v252_v46, %v68_v34  ;;  %v254_v49 = vpop.f32.mrb[3].mxu0 }
 0x10b   :  { %v356_v50 = vpack.c.bf16 %v251_v44, %v249_v40  ;;  %v255_v52 = vadd.f32 %v254_v49, %v72_v35 }
 0x10c   :  { %319 = vst [vmem:[%s511_s3 + $0x8] sm:$0xf] %v357_v43  ;;  %v359_v51 = vpack.c.bf16 %v295_v45, %v295_v45 }
 0x10d   :  { %318 = vst [vmem:[%s511_s3] sm:$0xff] %v356_v50  ;;  %v358_v53 = vpack.c.bf16 %v255_v52, %v253_v48 }
 0x10e   :  { %321 = vst [vmem:[%s511_s3 + $0x14] sm:$0xf] %v359_v51 }
 0x10f   :  { %320 = vst [vmem:[%s511_s3 + $0xc] sm:$0xff] %v358_v53 }
 0x110   :  { %326 = vsyncpa [#allocation3], 1 }

// kernel: mha_self_attention.4
= control target key start
LH: loop header
LB: loop body
LE: loop exit
PB: predicated region body
PF: predicated region fallthrough
CT: control target
= control target key end

     0   :  { %s1234_s12 = smov 0   ;;  %s1236_s13 = smov 0   ;;  %s1399_s0 = inlined_call_operand.vmem [shape: bf16[2,8,384], index: 0, kind: input, shape index: {}, may-alias: {0,1,2}]   ;;  %s1400_s1 = inlined_call_operand.vmem [shape: bf16[2,8,384], index: 1, kind: input, shape index: {}, may-alias: {0,1,2}]   ;;  %s1401_s2 = inlined_call_operand.vmem [shape: bf16[2,8,384], index: 2, kind: input, shape index: {}, may-alias: {0,1,2}]   ;;  %s1402_s3 = inlined_call_operand.vmem [shape: bf16[2,8,128], index: 3, kind: output, shape index: {}]  }
   0x1   :  { %s1238_s14 = smov 0  }
   0x2 LB: > { %s32_s15 = sadd.s32 1, %s1201_s13  ;;  %p1039_p0 = scmp.ge.s32.totalorder %s1205_s14, 1  ;;  %s1205_s14 = sphi %s1238_s14, %s13_s14   ;;  %s1201_s13 = sphi %s1236_s13, %s1404_s13   ;;  %s1197_s12 = sphi %s1234_s12, %s1403_s12  }
   0x3   : > { %p34_p1 = scmp.ge.s32.totalorder %s32_s15, 2  ;;  %p198_p2 = scmp.lt.s32.totalorder %s1205_s14, 3 }
   0x5   : > { %s1406_s15 = smov (%p34_p1, %s32_s15), 0  ;;  %p199_p3 = pnand %p1039_p0, %p198_p2 }
   0x6   : > { %p248_p4 = scmp.lt.s32.totalorder (!%p199_p3), %s1197_s12, 1  ;;  %v1207_v0 = vmov (!%p199_p3), 0.0   ;;  %vm1208_vm0 = vmmov (!%p199_p3), 0   ;;  %vm302_vm1 = vcmask (!%p199_p3), 261120   ;;  %vm289_vm2 = vcmask (!%p199_p3), 7168   ;;  %s1211_s23 = smov (!%p199_p3), 96  }
   0x7   : > { %202 = sbr.rel (%p199_p3) target bundleno = 1443 (0x5a3), region = 32  ;;  %1075 = vmatprep.subr.bf16.mxu0 (!%p199_p3), %v1207_v0  ;;  %298 = vst [vmem:[#allocation4] sm:$0xff] (!%p199_p3), %v1207_v0  ;;  %1077 = vmatprep.mubr.msk.bf16.mxu0 (!%p199_p3), %vm1208_vm0, %v1207_v0  ;;  %v1209_v4 = vmov (!%p199_p3), -inf   ;;  %294 = vst.msk [vmem:[#allocation3] sm:$0xff] (!%p199_p3), %vm289_vm2, %v1207_v0  ;;  %vm350_vm3 = vcmask (!%p199_p3), 64512   ;;  %v1210_v10 = vmov (!%p199_p3), 0  }
   0x8   : > { %1081 = vmatprep.subr.bf16.mxu1 (!%p199_p3), %v1207_v0  ;;  %1083 = vmatprep.mubr.msk.bf16.mxu1 (!%p199_p3), %vm1208_vm0, %v1207_v0  ;;  %290 = vst.msk [vmem:[#allocation2] sm:$0xff] (!%p199_p3), %vm289_vm2, %v1209_v4  ;;  %291 = vst.msk [vmem:[#allocation2 + $0x8] sm:$0xff] (!%p199_p3), %vm289_vm2, %v1209_v4  ;;  %s1212_s24 = smov (!%p199_p3), 64   ;;  %s1213_s25 = smov (!%p199_p3), 32   ;;  %vm378_vm4 = vcmask (!%p199_p3), 1043456   ;;  %vm577_vm5 = vcmask (!%p199_p3), 523520  }
   0x9   : > { %292 = vst.msk [vmem:[#allocation2 + $0x10] sm:$0xff] (!%p199_p3), %vm289_vm2, %v1209_v4  ;;  %293 = vst.msk [vmem:[#allocation2 + $0x18] sm:$0xff] (!%p199_p3), %vm289_vm2, %v1209_v4  ;;  %1155 = vset.pattern.permute.xlu0 (!%p199_p3), %v1210_v10  ;;  %1156 = vset.pattern.permute.xlu1 (!%p199_p3), %v1210_v10  ;;  %vm716_vm6 = vcmask (!%p199_p3), 785920   ;;  %vm855_vm7 = vcmask (!%p199_p3), 1048320  }
   0xa   : > { %295 = vst.msk [vmem:[#allocation3 + $0x8] sm:$0xff] (!%p199_p3), %vm289_vm2, %v1207_v0  ;;  %296 = vst.msk [vmem:[#allocation3 + $0x10] sm:$0xff] (!%p199_p3), %vm289_vm2, %v1207_v0 }
   0xb   : > { %297 = vst.msk [vmem:[#allocation3 + $0x18] sm:$0xff] (!%p199_p3), %vm289_vm2, %v1207_v0 }
   0xe   : > { %s1408_s12 = smov (!%p248_p4, %s1197_s12), 1 }
   0xf   : > { %s1262_s16 = smul.u32 12, %s1408_s12  ;;  %v349_v13 = vld [vmem:[#allocation2] sm:$0xff]  ;;  %v1327_v52 = vld [vmem:[#allocation2 + $0x8] sm:$0xff]  ;;  %s1043_s29 = sshll.u32 %s1408_s12, 2 }
  0x10   : > { %v631_v58 = vld [vmem:[#allocation2 + $0x10] sm:$0xff]  ;;  %v1336_v63 = vld [vmem:[#allocation2 + $0x18] sm:$0xff]  ;;  %s283_s5 = scalar_lea.vmem %s1402_s3, %s1043_s29 }
  0x11   : > { %s975_s19 = scalar_lea.vmem %s1400_s1, %s1262_s16  ;;  %s256_s22 = scalar_lea.vmem %s1399_s0, %s1262_s16 }
  0x12   : > { %v1044_v1 = vld [vmem:[%s975_s19 + $0x4] sm:$0xf]  ;;  %v299_v3 = vld [vmem:[%s256_s22] sm:$0xf]  ;;  %s981_s28 = scalar_lea.vmem %s1401_s2, %s1262_s16 }
  0x13   : > { %v307_v2 = vsel %vm302_vm1, %v1044_v1, 0  ;;  %v1049_v11 = vcombine.low %v1044_v1, %v1044_v1  ;;  %v1048_v12 = vcombine.low %v299_v3, %v299_v3  ;;  %v1045_v17 = vld [vmem:[%s981_s28 + $0x8] sm:$0xf] }
  0x14   : > { %1076 = vmatpush3.bf16.xpose.msra.mxu0 %v307_v2  ;;  %v380_v18 = vsel %vm378_vm4, %v1045_v17, 0  ;;  %v1051_v56 = vcombine.low %v1045_v17, %v1045_v17 }
  0x15   : > { %1093 = vmatprep.subr.bf16.mxu0 %v1207_v0  ;;  %440 = vrot.lane.b32.xlu1 %v1049_v11, %s1211_s23 }
  0x16   : > { %1082 = vmatpush3.bf16.msra.mxu1 %v380_v18 }
  0x17   : > { %1087 = vmatprep.subr.bf16.mxu1 %v1207_v0 }
  0x19   : > { %435 = vrot.lane.b32.xlu1 %v1048_v12, %s1211_s23 }
  0x1b   : > { %1078 = vmatmul.mubr.msk.bf16.vlgmr.msra.gmra.mrb[0].mxu0 %vm302_vm1, %v299_v3 }
  0x1c   : > { %1095 = vmatprep.mubr.msk.bf16.mxu0 %vm1208_vm0, %v1207_v0 }
  0x1d   : > { %582 = vrot.lane.b32.xlu1 %v1049_v11, %s1212_s24 }
  0x21   : > { %580 = vrot.lane.b32.xlu1 %v1048_v12, %s1212_s24 }
  0x25   : > { %721 = vrot.lane.b32.xlu1 %v1049_v11, %s1213_s25 }
  0x29   : > { %719 = vrot.lane.b32.xlu1 %v1048_v12, %s1213_s25 }
  0x87   : > { %v441_v22 = vpop.permute.xlu1 %440 }
  0x88   : > { %v446_v25 = vsel %vm302_vm1, %v441_v22, 0 }
  0x8b   : > { %v436_v23 = vpop.permute.xlu1 %435 }
  0x8f   : > { %v583_v27 = vpop.permute.xlu1 %582 }
  0x90   : > { %v588_v29 = vsel %vm302_vm1, %v583_v27, 0 }
  0x93   : > { %v581_v28 = vpop.permute.xlu1 %580 }
  0x97   : > { %v722_v30 = vpop.permute.xlu1 %721 }
  0x98   : > { %v727_v31 = vsel %vm302_vm1, %v722_v30, 0 }
  0x9b   : > { %v720_v32 = vpop.permute.xlu1 %719 }
  0xee   : > { %v343_v5 = vpop.f32.mrb[0].mxu0 }
  0xef   : > { %v1079_v6 = vpop.f32.mrb[1].mxu0  ;;  %v351_v7 = vsel %vm350_vm3, %v343_v5, -inf }
  0xf0   : > { %352 = vmax.xlane.f32.xlu0 %v351_v7  ;;  %v346_v8 = vpop.f32.mrb[2].mxu0 }
  0xf1   : > { %v1080_v9 = vpop.f32.mrb[3].mxu0 }
 0x17d   : > { %v353_v14 = vpop.xlane.xlu0 %352 }
 0x17e   : > { %v354_v15 = vmax.f32 %v349_v13, %v353_v14 }
 0x180   : > { %v355_v16 = vsub.f32 %v349_v13, %v354_v15  ;;  %431 = vst.msk [vmem:[#allocation2] sm:$0xff] %vm289_vm2, %v354_v15  ;;  %360 = vperm.xlu0 %1155, %v354_v15  }
 0x182   : > { %v356_v53 = vmul.f32 1.442695, %v355_v16 }
 0x1ff   : > { %v361_v19 = vpop.permute.xlu0 %360 }
 0x200   : > { %v363_v20 = vsub.f32 %v343_v5, %v361_v19 }
 0x202   : > { %v364_v21 = vmul.f32 1.442695, %v363_v20 }
 0x204   : > { %1159 = vpow2.f32 %v364_v21 }
 0x205   : > { %1161 = vpow2.f32 %v356_v53 }
 0x20e   : > { %v1303_v24 = vpop.eup %1159 }
 0x20f   : > { %v374_v26 = vpack.c.bf16 %v1303_v24, %v1303_v24  ;;  %v1334_v62 = vpop.eup %1161  ;;  %v368_v4 = vsel %vm350_vm3, %v1303_v24, 0.0 }
 0x211   : > { %1084 = vmatmul.mubr.msk.bf16.vlgmr.msra.gmra.mrb[0].mxu1 %vm350_vm3, %v374_v26 }
 0x212   : > { %1088 = vmatpush3.bf16.xpose.msra.mxu1 %v446_v25  ;;  %1089 = vmatprep.mubr.msk.bf16.mxu1 %vm1208_vm0, %v1207_v0 }
 0x213   : > { %1099 = vmatprep.subr.bf16.mxu1 %v1207_v0 }
 0x219   : > { %1090 = vmatmul.mubr.msk.bf16.vlgmr.msra.gmra.mrb[4].mxu1 %vm302_vm1, %v436_v23 }
 0x21a   : > { %1100 = vmatpush3.bf16.xpose.msra.mxu1 %v588_v29  ;;  %1101 = vmatprep.mubr.msk.bf16.mxu1 %vm1208_vm0, %v1207_v0 }
 0x21b   : > { %1111 = vmatprep.subr.bf16.mxu1 %v1207_v0 }
 0x221   : > { %1102 = vmatmul.mubr.msk.bf16.vlgmr.msra.gmra.mrb[8].mxu1 %vm302_vm1, %v581_v28 }
 0x222   : > { %1112 = vmatpush3.bf16.xpose.msra.mxu1 %v727_v31  ;;  %1113 = vmatprep.mubr.msk.bf16.mxu1 %vm1208_vm0, %v1207_v0 }
 0x229   : > { %1114 = vmatmul.mubr.msk.bf16.vlgmr.msra.gmra.mrb[12].mxu1 %vm302_vm1, %v720_v32 }
 0x2e4   : > { %v1322_v33 = vpop.f32.mrb[0].mxu1 }
 0x2e5   : > { %v1085_v34 = vpop.f32.mrb[1].mxu1 }
 0x2e6   : > { %v419_v35 = vpop.f32.mrb[2].mxu1 }
 0x2e7   : > { %v1086_v36 = vpop.f32.mrb[3].mxu1 }
 0x2e8   : > { %v366_v36 = vld [vmem:[#allocation3] sm:$0xff] }
 0x2ec   : > { %v482_v37 = vpop.f32.mrb[4].mxu1 }
 0x2ed   : > { %v1091_v38 = vpop.f32.mrb[5].mxu1  ;;  %v490_v39 = vsel %vm350_vm3, %v482_v37, -inf }
 0x2ee   : > { %491 = vmax.xlane.f32.xlu1 %v490_v39  ;;  %v485_v40 = vpop.f32.mrb[6].mxu1 }
 0x2ef   : > { %v1092_v41 = vpop.f32.mrb[7].mxu1 }
 0x2f4   : > { %v624_v42 = vpop.f32.mrb[8].mxu1 }
 0x2f5   : > { %v1103_v43 = vpop.f32.mrb[9].mxu1  ;;  %v632_v44 = vsel %vm350_vm3, %v624_v42, -inf }
 0x2f6   : > { %633 = vmax.xlane.f32.xlu0 %v632_v44  ;;  %v627_v45 = vpop.f32.mrb[10].mxu1  ;;  %v648_v44 = vld [vmem:[#allocation3 + $0x10] sm:$0xff] }
 0x2f7   : > { %v1104_v46 = vpop.f32.mrb[11].mxu1 }
 0x2fc   : > { %v763_v47 = vpop.f32.mrb[12].mxu1 }
 0x2fd   : > { %v1115_v48 = vpop.f32.mrb[13].mxu1  ;;  %v771_v49 = vsel %vm350_vm3, %v763_v47, -inf }
 0x2fe   : > { %772 = vmax.xlane.f32.xlu1 %v771_v49  ;;  %v766_v50 = vpop.f32.mrb[14].mxu1  ;;  %v787_v49 = vld [vmem:[#allocation3 + $0x18] sm:$0xff] }
 0x2ff   : > { %v1116_v51 = vpop.f32.mrb[15].mxu1 }
 0x37b   : > { %v492_v54 = vpop.xlane.xlu1 %491 }
 0x37c   : > { %v493_v55 = vmax.f32 %v1327_v52, %v492_v54 }
 0x37e   : > { %v494_v57 = vsub.f32 %v1327_v52, %v493_v55  ;;  %579 = vst.msk [vmem:[#allocation2 + $0x8] sm:$0xff] %vm289_vm2, %v493_v55  ;;  %499 = vperm.xlu1 %1156, %v493_v55  }
 0x380   : > { %v495_v29 = vmul.f32 1.442695, %v494_v57 }
 0x382   : > { %517 = vrot.lane.b32.xlu1 %v1051_v56, %s1211_s23 }
 0x383   : > { %v634_v59 = vpop.xlane.xlu0 %633 }
 0x384   : > { %v635_v60 = vmax.f32 %v631_v58, %v634_v59 }
 0x386   : > { %v636_v61 = vsub.f32 %v631_v58, %v635_v60  ;;  %718 = vst.msk [vmem:[#allocation2 + $0x10] sm:$0xff] %vm289_vm2, %v635_v60  ;;  %641 = vperm.xlu0 %1155, %v635_v60  }
 0x388   : > { %v637_v31 = vmul.f32 1.442695, %v636_v61 }
 0x38a   : > { %425 = vperm.xlu0 %1155, %v1334_v62  }
 0x38b   : > { %v773_v1 = vpop.xlane.xlu1 %772 }
 0x38c   : > { %v1340_v2 = vmax.f32 %v1336_v63, %v773_v1 }
 0x38e   : > { %v775_v3 = vsub.f32 %v1336_v63, %v1340_v2  ;;  %857 = vst.msk [vmem:[#allocation2 + $0x18] sm:$0xff] %vm289_vm2, %v1340_v2  ;;  %780 = vperm.xlu1 %1156, %v1340_v2  }
 0x390   : > { %v776_v40 = vmul.f32 1.442695, %v775_v3 }
 0x392   : > { %656 = vrot.lane.b32.xlu1 %v1051_v56, %s1212_s24 }
 0x396   : > { %795 = vrot.lane.b32.xlu1 %v1051_v56, %s1213_s25 }
 0x3ba   : > { %369 = vadd.xlane.f32.xlu1 %v368_v4 }
 0x3fd   : > { %v500_v5 = vpop.permute.xlu1 %499 }
 0x3fe   : > { %v502_v6 = vsub.f32 %v482_v37, %v500_v5  ;;  %v367_v37 = vmul.f32 %v1334_v62, %v366_v36 }
 0x400   : > { %v503_v7 = vmul.f32 1.442695, %v502_v6 }
 0x401   : > { %v518_v8 = vpop.permute.xlu1 %517 }
 0x402   : > { %1163 = vpow2.f32 %v503_v7  ;;  %v523_v9 = vsel %vm378_vm4, %v518_v8, 0 }
 0x403   : > { %1094 = vmatpush3.bf16.msra.mxu0 %v523_v9 }
 0x404   : > { %1105 = vmatprep.subr.bf16.mxu0 %v1207_v0 }
 0x405   : > { %v642_v10 = vpop.permute.xlu0 %641 }
 0x406   : > { %v644_v11 = vsub.f32 %v624_v42, %v642_v10 }
 0x408   : > { %v645_v12 = vmul.f32 1.442695, %v644_v11 }
 0x409   : > { %v426_v13 = vpop.permute.xlu0 %425 }
 0x40a   : > { %1165 = vpow2.f32 %v645_v12  ;;  %v428_v14 = vmul.f32 0.0, %v426_v13 }
 0x40c   : > { %v1164_v15 = vpop.eup %1163  ;;  %v429_v16 = vadd.f32 %v428_v14, %v1322_v33 }
 0x40d   : > { %v781_v17 = vpop.permute.xlu1 %780  ;;  %v508_v18 = vsel %vm350_vm3, %v1164_v15, 0.0  ;;  %v513_v19 = vpack.c.bf16 %v1164_v15, %v1164_v15 }
 0x40e   : > { %430 = vst.msk [vmem:[#allocation4] sm:$0xff] %vm302_vm1, %v429_v16  ;;  %v783_v20 = vsub.f32 %v763_v47, %v781_v17  ;;  %509 = vadd.xlane.f32.xlu0 %v508_v18 }
 0x40f   : > { %1096 = vmatmul.mubr.msk.bf16.vlgmr.msra.gmra.mrb[4].mxu0 %vm350_vm3, %v513_v19 }
 0x410   : > { %v784_v21 = vmul.f32 1.442695, %v783_v20  ;;  %1107 = vmatprep.mubr.msk.bf16.mxu0 %vm1208_vm0, %v1207_v0 }
 0x411   : > { %v657_v22 = vpop.permute.xlu1 %656 }
 0x412   : > { %1167 = vpow2.f32 %v784_v21  ;;  %v662_v23 = vsel %vm378_vm4, %v657_v22, 0 }
 0x413   : > { %1106 = vmatpush3.bf16.msra.mxu0 %v662_v23  ;;  %1169 = vpow2.f32 %v495_v29 }
 0x414   : > { %v1166_v24 = vpop.eup %1165  ;;  %1117 = vmatprep.subr.bf16.mxu0 %v1207_v0  ;;  %1171 = vpow2.f32 %v637_v31 }
 0x415   : > { %v650_v25 = vsel %vm350_vm3, %v1166_v24, 0.0  ;;  %v655_v26 = vpack.c.bf16 %v1166_v24, %v1166_v24  ;;  %v796_v27 = vpop.permute.xlu1 %795  ;;  %1173 = vpow2.f32 %v776_v40  ;;  %v565_v11 = vld [vmem:[#allocation4] sm:$0xff] }
 0x416   : > { %651 = vadd.xlane.f32.xlu1 %v650_v25  ;;  %v801_v28 = vsel %vm378_vm4, %v796_v27, 0 }
 0x417   : > { %1108 = vmatmul.mubr.msk.bf16.vlgmr.msra.gmra.mrb[8].mxu0 %vm350_vm3, %v655_v26 }
 0x418   : > { %1118 = vmatpush3.bf16.msra.mxu0 %v801_v28  ;;  %1119 = vmatprep.mubr.msk.bf16.mxu0 %vm1208_vm0, %v1207_v0  ;;  %v506_v0 = vld [vmem:[#allocation3 + $0x8] sm:$0xff] }
 0x41c   : > { %v1168_v30 = vpop.eup %1167 }
 0x41d   : > { %v789_v32 = vsel %vm350_vm3, %v1168_v30, 0.0  ;;  %v794_v33 = vpack.c.bf16 %v1168_v30, %v1168_v30  ;;  %v1170_v34 = vpop.eup %1169 }
 0x41e   : > { %790 = vadd.xlane.f32.xlu0 %v789_v32  ;;  %v1172_v35 = vpop.eup %1171  ;;  %v507_v41 = vmul.f32 %v1170_v34, %v506_v0 }
 0x41f   : > { %1120 = vmatmul.mubr.msk.bf16.vlgmr.msra.gmra.mrb[12].mxu0 %vm350_vm3, %v794_v33  ;;  %v649_v45 = vmul.f32 %v1172_v35, %v648_v44  ;;  %v1174_v48 = vpop.eup %1173 }
 0x420   : > { %v788_v50 = vmul.f32 %v1174_v48, %v787_v49 }
 0x427   : > { %568 = vperm.xlu1 %1156, %v1170_v34  }
 0x42b   : > { %707 = vperm.xlu1 %1156, %v1172_v35  }
 0x447   : > { %v370_v38 = vpop.xlane.xlu1 %369 }
 0x448   : > { %v371_v39 = vadd.f32 %v370_v38, %v367_v37 }
 0x44a   : > { %373 = vst.msk [vmem:[#allocation3] sm:$0xff] %vm289_vm2, %v371_v39 }
 0x451   : > { %v861_v53 = vld [vmem:[#allocation3] sm:$0xff] }
 0x452   : > { %1175 = vrcp.f32 %v861_v53 }
 0x45c   : > { %v1176_v60 = vpop.eup %1175 }
 0x49b   : > { %v510_v42 = vpop.xlane.xlu0 %509 }
 0x49c   : > { %v511_v43 = vadd.f32 %v510_v42, %v507_v41 }
 0x49e   : > { %512 = vst.msk [vmem:[#allocation3 + $0x8] sm:$0xff] %vm289_vm2, %v511_v43 }
 0x4a3   : > { %v652_v46 = vpop.xlane.xlu1 %651 }
 0x4a4   : > { %v653_v47 = vadd.f32 %v652_v46, %v649_v45 }
 0x4a5   : > { %v871_v59 = vld [vmem:[#allocation3 + $0x8] sm:$0xff] }
 0x4a6   : > { %654 = vst.msk [vmem:[#allocation3 + $0x10] sm:$0xff] %vm289_vm2, %v653_v47 }
 0x4a7   : > { %v569_v10 = vpop.permute.xlu1 %568 }
 0x4a8   : > { %v571_v12 = vmul.f32 %v569_v10, %v565_v11 }
 0x4ab   : > { %v791_v51 = vpop.xlane.xlu0 %790  ;;  %v708_v15 = vpop.permute.xlu1 %707 }
 0x4ac   : > { %v792_v52 = vadd.f32 %v791_v51, %v788_v50 }
 0x4ad   : > { %v881_v54 = vld [vmem:[#allocation3 + $0x10] sm:$0xff] }
 0x4ae   : > { %793 = vst.msk [vmem:[#allocation3 + $0x18] sm:$0xff] %vm289_vm2, %v792_v52  ;;  %1177 = vrcp.f32 %v881_v54 }
 0x4af   : > { %1179 = vrcp.f32 %v871_v59 }
 0x4b5   : > { %v891_v2 = vld [vmem:[#allocation3 + $0x18] sm:$0xff] }
 0x4b6   : > { %1181 = vrcp.f32 %v891_v2 }
 0x4b8   : > { %v1178_v3 = vpop.eup %1177 }
 0x4b9   : > { %v1180_v8 = vpop.eup %1179 }
 0x4c0   : > { %v1182_v9 = vpop.eup %1181 }
 0x4e2   : > { %v559_v55 = vpop.f32.mrb[4].mxu0 }
 0x4e3   : > { %573 = vrot.lane.b32.xlu0 %v559_v55, %s1213_s25  ;;  %v1097_v56 = vpop.f32.mrb[5].mxu0 }
 0x4e4   : > { %v562_v57 = vpop.f32.mrb[6].mxu0 }
 0x4e5   : > { %v1098_v58 = vpop.f32.mrb[7].mxu0 }
 0x4e7   : > { %846 = vperm.xlu0 %1155, %v1174_v48  }
 0x4ea   : > { %v698_v61 = vpop.f32.mrb[8].mxu0 }
 0x4eb   : > { %866 = vperm.xlu0 %1155, %v1176_v60   ;;  %712 = vrot.lane.b32.xlu1 %v698_v61, %s1212_s24  ;;  %v1109_v62 = vpop.f32.mrb[9].mxu0 }
 0x4ec   : > { %v701_v63 = vpop.f32.mrb[10].mxu0 }
 0x4ed   : > { %v1110_v1 = vpop.f32.mrb[11].mxu0 }
 0x4ef   : > { %886 = vperm.xlu0 %1155, %v1178_v3  }
 0x4f2   : > { %v837_v4 = vpop.f32.mrb[12].mxu0 }
 0x4f3   : > { %851 = vrot.lane.b32.xlu1 %v837_v4, %s1211_s23  ;;  %v1121_v5 = vpop.f32.mrb[13].mxu0 }
 0x4f4   : > { %v840_v6 = vpop.f32.mrb[14].mxu0 }
 0x4f5   : > { %v1122_v7 = vpop.f32.mrb[15].mxu0 }
 0x4f7   : > { %876 = vperm.xlu1 %1156, %v1180_v8  }
 0x4fb   : > { %896 = vperm.xlu1 %1156, %v1182_v9  }
 0x555   : > { %v574_v13 = vpop.permute.xlu0 %573 }
 0x556   : > { %v576_v14 = vadd.f32 %v574_v13, %v571_v12 }
 0x558   : > { %578 = vst.msk [vmem:[#allocation4] sm:$0xff] %vm577_vm5, %v576_v14 }
 0x55d   : > { %v713_v18 = vpop.permute.xlu1 %712 }
 0x55f   : > { %v704_v16 = vld [vmem:[#allocation4] sm:$0xff] }
 0x560   : > { %v710_v17 = vmul.f32 %v708_v15, %v704_v16 }
 0x562   : > { %v715_v19 = vadd.f32 %v713_v18, %v710_v17 }
 0x564   : > { %717 = vst.msk [vmem:[#allocation4] sm:$0xff] %vm716_vm6, %v715_v19 }
 0x565   : > { %v852_v23 = vpop.permute.xlu1 %851 }
 0x566   : > { %v847_v20 = vpop.permute.xlu0 %846 }
 0x56a   : > { %v867_v25 = vpop.permute.xlu0 %866 }
 0x56b   : > { %v843_v21 = vld [vmem:[#allocation4] sm:$0xff] }
 0x56c   : > { %v849_v22 = vmul.f32 %v847_v20, %v843_v21 }
 0x56e   : > { %v854_v24 = vadd.f32 %v852_v23, %v849_v22  ;;  %v887_v31 = vpop.permute.xlu0 %886 }
 0x570   : > { %856 = vst.msk [vmem:[#allocation4] sm:$0xff] %vm855_vm7, %v854_v24 }
 0x576   : > { %v877_v29 = vpop.permute.xlu1 %876 }
 0x577   : > { %v863_v26 = vld [vmem:[#allocation4] sm:$0xff] }
 0x578   : > { %v869_v27 = vmul.f32 %v867_v25, %v863_v26 }
 0x57a   : > { %870 = vst.msk [vmem:[#allocation4] sm:$0xff] %vm302_vm1, %v869_v27  ;;  %v897_v35 = vpop.permute.xlu1 %896 }
 0x581   : > { %v873_v28 = vld [vmem:[#allocation4] sm:$0xff] }
 0x582   : > { %v879_v30 = vmul.f32 %v877_v29, %v873_v28 }
 0x584   : > { %880 = vst.msk [vmem:[#allocation4] sm:$0xff] %vm577_vm5, %v879_v30 }
 0x58b   : > { %v883_v32 = vld [vmem:[#allocation4] sm:$0xff] }
 0x58c   : > { %v889_v33 = vmul.f32 %v887_v31, %v883_v32 }
 0x58e   : > { %890 = vst.msk [vmem:[#allocation4] sm:$0xff] %vm716_vm6, %v889_v33 }
 0x595   : > { %v893_v34 = vld [vmem:[#allocation4] sm:$0xff] }
 0x596   : > { %v899_v36 = vmul.f32 %v897_v35, %v893_v34 }
 0x598   : > { %900 = vst.msk [vmem:[#allocation4] sm:$0xff] %vm855_vm7, %v899_v36 }
 0x59f   : > { %v901_v37 = vld [vmem:[#allocation4] sm:$0xff] }
 0x5a0   : > { %v902_v38 = vpack.c.bf16 %v901_v37, %v901_v37 }
 0x5a2   : > { %903 = vst [vmem:[%s283_s5] sm:$0xf] %v902_v38 }
 0x5a3 PF: > { %s13_s14 = sadd.s32 1, %s1205_s14   ;;  %s1403_s12 = smov %s1201_s13 }
 0x5a4   : > { %p10_p5 = scmp.ge.s32.totalorder %s13_s14, 4   ;;  %s1404_s13 = smov %s1406_s15 }
 0x5a6   :  { %12 = sbr.rel (!%p10_p5) target bundleno = 2 (0x2), region = 82 }

</bundles_post_ra>
